<compile_context>
chip_gen: v7x
topology: tpu7x:2x2x1
jax: 0.10.0
libtpu: 0.0.40
codegen_flags: <defaults>
</compile_context>

<pallas_src>
import functools
import math

import jax
import jax.numpy as jnp
from jax import lax
from jax.experimental import pallas as pl
from jax.experimental.pallas import tpu as pltpu


# --------------------------- Pallas kernel -----------------------------------

def _fused_attention_kernel(x_ref, qkvw_ref, qkvb_ref, projw_ref, projb_ref,
                            o_ref, *, num_heads, head_dim):
    C = num_heads * head_dim
    x = x_ref[0].astype(jnp.bfloat16)                              # (N, C)

    # qkv projection (attention scale already folded into the q columns).
    qkv = jnp.dot(x, qkvw_ref[...],
                  preferred_element_type=jnp.float32) + qkvb_ref[...]  # (N, 3C)

    head_outs = []
    for h in range(num_heads):                 # static unroll over heads
        lo = h * head_dim
        q = qkv[:, lo:lo + head_dim].astype(jnp.bfloat16)              # (N, d)
        k = qkv[:, C + lo:C + lo + head_dim].astype(jnp.bfloat16)      # (N, d)
        v = qkv[:, 2 * C + lo:2 * C + lo + head_dim].astype(jnp.bfloat16)

        # q @ k^T without an explicit transpose: contract the last dims.
        s = lax.dot_general(q, k,
                            dimension_numbers=(((1,), (1,)), ((), ())),
                            preferred_element_type=jnp.float32)        # (N, N)
        m = jnp.max(s, axis=-1, keepdims=True)
        p = jnp.exp(s - m)
        denom = jnp.sum(p, axis=-1, keepdims=True)
        attn = p * pl.reciprocal(denom, approx=True)
        head_outs.append(jnp.dot(attn.astype(jnp.bfloat16), v,
                                 preferred_element_type=jnp.float32))  # (N, d)

    # Heads packed along the last dim == torch permute(0,2,3,1,4).reshape(..,C)
    o = jnp.concatenate(head_outs, axis=-1).astype(jnp.bfloat16)       # (N, C)

    y = jnp.dot(o, projw_ref[...],
                preferred_element_type=jnp.float32) + projb_ref[...]   # (N, C)
    o_ref[0] = y.astype(o_ref.dtype)


# ------------------------------ wrapper ---------------------------------------

def attention_forward(x, params, *, num_heads):
    B, H, W, C = x.shape
    N = H * W
    head_dim = C // num_heads
    scale = head_dim ** (-0.5)

    # Fold the attention scale into the q part of the qkv weight/bias; feed the
    # MXU bf16 weights (f32 accumulation happens inside the kernel).
    scale_vec = jnp.concatenate([jnp.full((C,), scale, jnp.float32),
                                 jnp.ones((2 * C,), jnp.float32)])
    qkv_w = (params["qkv_w"] * scale_vec[None, :]).astype(jnp.bfloat16)
    qkv_b = (params["qkv_b"] * scale_vec).astype(jnp.float32).reshape(1, 3 * C)
    proj_w = params["proj_w"].astype(jnp.bfloat16)
    proj_b = params["proj_b"].astype(jnp.float32).reshape(1, C)

    kernel = functools.partial(_fused_attention_kernel,
                               num_heads=num_heads, head_dim=head_dim)
    out = pl.pallas_call(
        kernel,
        out_shape=jax.ShapeDtypeStruct((B, N, C), x.dtype),
        grid=(B,),
        in_specs=[
            pl.BlockSpec((1, N, C), lambda b: (b, 0, 0)),
            pl.BlockSpec((C, 3 * C), lambda b: (0, 0)),
            pl.BlockSpec((1, 3 * C), lambda b: (0, 0)),
            pl.BlockSpec((C, C), lambda b: (0, 0)),
            pl.BlockSpec((1, C), lambda b: (0, 0)),
        ],
        out_specs=pl.BlockSpec((1, N, C), lambda b: (b, 0, 0)),
        compiler_params=pltpu.CompilerParams(
            dimension_semantics=("parallel",)),
    )(x.reshape(B, N, C), qkv_w, qkv_b, proj_w, proj_b)
    return out.reshape(B, H, W, C)


# ------------------------- pure-JAX f32 reference -----------------------------

def attention_reference(x, params, *, num_heads):
    B, H, W, C = x.shape
    N = H * W
    d = C // num_heads
    scale = d ** (-0.5)
    qkv = x.reshape(B, N, C) @ params["qkv_w"] + params["qkv_b"]
    qkv = qkv.reshape(B, N, 3, num_heads, d)
    qkv = jnp.transpose(qkv, (2, 0, 3, 1, 4)).reshape(3, B * num_heads, N, d)
    q, k, v = qkv[0], qkv[1], qkv[2]
    attn = jax.nn.softmax((q * scale) @ jnp.swapaxes(k, -2, -1), axis=-1)
    o = (attn @ v).reshape(B, num_heads, N, d)
    o = jnp.transpose(o, (0, 2, 1, 3)).reshape(B, N, C)
    y = o @ params["proj_w"] + params["proj_b"]
    return y.reshape(B, H, W, C)


# ------------------------------ main ------------------------------------------

def init_params(key, dim):
    ks = jax.random.split(key, 4)

    def w(k, shape, fan_in):
        return jax.random.normal(k, shape, jnp.float32) / math.sqrt(fan_in)

    return {
        "qkv_w": w(ks[0], (dim, 3 * dim), dim),
        "qkv_b": 0.01 * jax.random.normal(ks[1], (3 * dim,), jnp.float32),
        "proj_w": w(ks[2], (dim, dim), dim),
        "proj_b": 0.01 * jax.random.normal(ks[3], (dim,), jnp.float32),
    }


if __name__ == "__main__":
    B, H, W, C = 2, 8, 8, 128
    num_heads = 4

    key = jax.random.PRNGKey(0)
    kx, kp = jax.random.split(key)
    x = jax.random.normal(kx, (B, H, W, C), jnp.float32)
    params = init_params(kp, C)

    fwd = jax.jit(functools.partial(attention_forward, num_heads=num_heads))
    out = fwd(x, params)
    jax.block_until_ready(out)
    assert out.shape == (B, H, W, C) and out.dtype == jnp.float32

    ref = attention_reference(x, params, num_heads=num_heads)
    err = float(jnp.max(jnp.abs(out - ref)))
    assert err < 1e-1, f"max abs error vs f32 reference: {err}"
    print("KERNEL_OK")
</pallas_src>

<mosaic_0001>
module attributes {stable_mosaic.version = 11 : i64} {
  func.func @_fused_attention_kernel(%arg0: i32, %arg1: memref<1x64x128xf32, #tpu.memory_space<vmem>>, %arg2: memref<128x384xbf16, #tpu.memory_space<vmem>>, %arg3: memref<1x384xf32, #tpu.memory_space<vmem>>, %arg4: memref<128x128xbf16, #tpu.memory_space<vmem>>, %arg5: memref<1x128xf32, #tpu.memory_space<vmem>>, %arg6: memref<1x64x128xf32, #tpu.memory_space<vmem>>) attributes {dimension_semantics = [#tpu.dimension_semantics<parallel>], iteration_bounds = array<i64: 2>, scalar_prefetch = 0 : i64, scratch_operands = 0 : i64, tpu.core_type = #tpu.core_type<tc>, window_params = [{transform_indices = @transform_0, window_bounds = array<i64: 1, 64, 128>}, {pipeline_mode = #tpu.pipeline_mode<synchronous>, transform_indices = @transform_1, window_bounds = array<i64: 128, 384>}, {pipeline_mode = #tpu.pipeline_mode<synchronous>, transform_indices = @transform_2, window_bounds = array<i64: 1, 384>}, {pipeline_mode = #tpu.pipeline_mode<synchronous>, transform_indices = @transform_3, window_bounds = array<i64: 128, 128>}, {pipeline_mode = #tpu.pipeline_mode<synchronous>, transform_indices = @transform_4, window_bounds = array<i64: 1, 128>}, {transform_indices = @transform_5, window_bounds = array<i64: 1, 64, 128>}]} {
    %c0 = arith.constant 0 : index
    %c0_0 = arith.constant 0 : index
    %c0_1 = arith.constant 0 : index
    %0 = vector.load %arg1[%c0, %c0_0, %c0_1] : memref<1x64x128xf32, #tpu.memory_space<vmem>>, vector<1x64x128xf32>
    %1 = vector.shape_cast %0 : vector<1x64x128xf32> to vector<64x128xf32>
    %2 = arith.truncf %1 : vector<64x128xf32> to vector<64x128xbf16>
    %c0_2 = arith.constant 0 : index
    %c0_3 = arith.constant 0 : index
    %3 = vector.load %arg2[%c0_2, %c0_3] : memref<128x384xbf16, #tpu.memory_space<vmem>>, vector<128x384xbf16>
    %cst = arith.constant dense<0.000000e+00> : vector<64x384xf32>
    %4 = tpu.matmul %2, %3, %cst {dimension_numbers = #tpu.dot_dimension_numbers<[1], [0], [0], [1], [0, 0, 1, 1], [], []>} : vector<64x128xbf16>, vector<128x384xbf16>, vector<64x384xf32> -> vector<64x384xf32>
    %c0_4 = arith.constant 0 : index
    %c0_5 = arith.constant 0 : index
    %5 = vector.load %arg3[%c0_4, %c0_5] : memref<1x384xf32, #tpu.memory_space<vmem>>, vector<1x384xf32>
    %6 = vector.broadcast %5 : vector<1x384xf32> to vector<64x384xf32>
    %7 = arith.addf %4, %6 : vector<64x384xf32>
    %8 = vector.extract_strided_slice %7 {offsets = [0, 0], sizes = [64, 32], strides = [1, 1]} : vector<64x384xf32> to vector<64x32xf32>
    %9 = arith.truncf %8 : vector<64x32xf32> to vector<64x32xbf16>
    %10 = vector.extract_strided_slice %7 {offsets = [0, 128], sizes = [64, 32], strides = [1, 1]} : vector<64x384xf32> to vector<64x32xf32>
    %11 = arith.truncf %10 : vector<64x32xf32> to vector<64x32xbf16>
    %12 = vector.extract_strided_slice %7 {offsets = [0, 256], sizes = [64, 32], strides = [1, 1]} : vector<64x384xf32> to vector<64x32xf32>
    %13 = arith.truncf %12 : vector<64x32xf32> to vector<64x32xbf16>
    %cst_6 = arith.constant dense<0.000000e+00> : vector<64x64xf32>
    %14 = tpu.matmul %9, %11, %cst_6 {dimension_numbers = #tpu.dot_dimension_numbers<[1], [1], [0], [0], [0, 0, 1, 0], [], []>} : vector<64x32xbf16>, vector<64x32xbf16>, vector<64x64xf32> -> vector<64x64xf32>
    %cst_7 = arith.constant dense<0xFF800000> : vector<64xf32>
    %15 = vector.multi_reduction <maximumf>, %14, %cst_7 [1] : vector<64x64xf32> to vector<64xf32>
    %16 = vector.shape_cast %15 : vector<64xf32> to vector<64x1xf32>
    %17 = vector.broadcast %16 : vector<64x1xf32> to vector<64x64xf32>
    %18 = arith.subf %14, %17 : vector<64x64xf32>
    %19 = math.exp %18 : vector<64x64xf32>
    %cst_8 = arith.constant dense<0.000000e+00> : vector<64xf32>
    %20 = vector.multi_reduction <add>, %19, %cst_8 [1] : vector<64x64xf32> to vector<64xf32>
    %21 = vector.shape_cast %20 : vector<64xf32> to vector<64x1xf32>
    %22 = tpu.reciprocal %21 {approx = true} : vector<64x1xf32> -> vector<64x1xf32>
    %23 = vector.broadcast %22 : vector<64x1xf32> to vector<64x64xf32>
    %24 = arith.mulf %19, %23 : vector<64x64xf32>
    %25 = arith.truncf %24 : vector<64x64xf32> to vector<64x64xbf16>
    %cst_9 = arith.constant dense<0.000000e+00> : vector<64x32xf32>
    %26 = tpu.matmul %25, %13, %cst_9 {dimension_numbers = #tpu.dot_dimension_numbers<[1], [0], [0], [1], [0, 0, 1, 1], [], []>} : vector<64x64xbf16>, vector<64x32xbf16>, vector<64x32xf32> -> vector<64x32xf32>
    %27 = vector.extract_strided_slice %7 {offsets = [0, 32], sizes = [64, 32], strides = [1, 1]} : vector<64x384xf32> to vector<64x32xf32>
    %28 = arith.truncf %27 : vector<64x32xf32> to vector<64x32xbf16>
    %29 = vector.extract_strided_slice %7 {offsets = [0, 160], sizes = [64, 32], strides = [1, 1]} : vector<64x384xf32> to vector<64x32xf32>
    %30 = arith.truncf %29 : vector<64x32xf32> to vector<64x32xbf16>
    %31 = vector.extract_strided_slice %7 {offsets = [0, 288], sizes = [64, 32], strides = [1, 1]} : vector<64x384xf32> to vector<64x32xf32>
    %32 = arith.truncf %31 : vector<64x32xf32> to vector<64x32xbf16>
    %cst_10 = arith.constant dense<0.000000e+00> : vector<64x64xf32>
    %33 = tpu.matmul %28, %30, %cst_10 {dimension_numbers = #tpu.dot_dimension_numbers<[1], [1], [0], [0], [0, 0, 1, 0], [], []>} : vector<64x32xbf16>, vector<64x32xbf16>, vector<64x64xf32> -> vector<64x64xf32>
    %cst_11 = arith.constant dense<0xFF800000> : vector<64xf32>
    %34 = vector.multi_reduction <maximumf>, %33, %cst_11 [1] : vector<64x64xf32> to vector<64xf32>
    %35 = vector.shape_cast %34 : vector<64xf32> to vector<64x1xf32>
    %36 = vector.broadcast %35 : vector<64x1xf32> to vector<64x64xf32>
    %37 = arith.subf %33, %36 : vector<64x64xf32>
    %38 = math.exp %37 : vector<64x64xf32>
    %cst_12 = arith.constant dense<0.000000e+00> : vector<64xf32>
    %39 = vector.multi_reduction <add>, %38, %cst_12 [1] : vector<64x64xf32> to vector<64xf32>
    %40 = vector.shape_cast %39 : vector<64xf32> to vector<64x1xf32>
    %41 = tpu.reciprocal %40 {approx = true} : vector<64x1xf32> -> vector<64x1xf32>
    %42 = vector.broadcast %41 : vector<64x1xf32> to vector<64x64xf32>
    %43 = arith.mulf %38, %42 : vector<64x64xf32>
    %44 = arith.truncf %43 : vector<64x64xf32> to vector<64x64xbf16>
    %cst_13 = arith.constant dense<0.000000e+00> : vector<64x32xf32>
    %45 = tpu.matmul %44, %32, %cst_13 {dimension_numbers = #tpu.dot_dimension_numbers<[1], [0], [0], [1], [0, 0, 1, 1], [], []>} : vector<64x64xbf16>, vector<64x32xbf16>, vector<64x32xf32> -> vector<64x32xf32>
    %46 = vector.extract_strided_slice %7 {offsets = [0, 64], sizes = [64, 32], strides = [1, 1]} : vector<64x384xf32> to vector<64x32xf32>
    %47 = arith.truncf %46 : vector<64x32xf32> to vector<64x32xbf16>
    %48 = vector.extract_strided_slice %7 {offsets = [0, 192], sizes = [64, 32], strides = [1, 1]} : vector<64x384xf32> to vector<64x32xf32>
    %49 = arith.truncf %48 : vector<64x32xf32> to vector<64x32xbf16>
    %50 = vector.extract_strided_slice %7 {offsets = [0, 320], sizes = [64, 32], strides = [1, 1]} : vector<64x384xf32> to vector<64x32xf32>
    %51 = arith.truncf %50 : vector<64x32xf32> to vector<64x32xbf16>
    %cst_14 = arith.constant dense<0.000000e+00> : vector<64x64xf32>
    %52 = tpu.matmul %47, %49, %cst_14 {dimension_numbers = #tpu.dot_dimension_numbers<[1], [1], [0], [0], [0, 0, 1, 0], [], []>} : vector<64x32xbf16>, vector<64x32xbf16>, vector<64x64xf32> -> vector<64x64xf32>
    %cst_15 = arith.constant dense<0xFF800000> : vector<64xf32>
    %53 = vector.multi_reduction <maximumf>, %52, %cst_15 [1] : vector<64x64xf32> to vector<64xf32>
    %54 = vector.shape_cast %53 : vector<64xf32> to vector<64x1xf32>
    %55 = vector.broadcast %54 : vector<64x1xf32> to vector<64x64xf32>
    %56 = arith.subf %52, %55 : vector<64x64xf32>
    %57 = math.exp %56 : vector<64x64xf32>
    %cst_16 = arith.constant dense<0.000000e+00> : vector<64xf32>
    %58 = vector.multi_reduction <add>, %57, %cst_16 [1] : vector<64x64xf32> to vector<64xf32>
    %59 = vector.shape_cast %58 : vector<64xf32> to vector<64x1xf32>
    %60 = tpu.reciprocal %59 {approx = true} : vector<64x1xf32> -> vector<64x1xf32>
    %61 = vector.broadcast %60 : vector<64x1xf32> to vector<64x64xf32>
    %62 = arith.mulf %57, %61 : vector<64x64xf32>
    %63 = arith.truncf %62 : vector<64x64xf32> to vector<64x64xbf16>
    %cst_17 = arith.constant dense<0.000000e+00> : vector<64x32xf32>
    %64 = tpu.matmul %63, %51, %cst_17 {dimension_numbers = #tpu.dot_dimension_numbers<[1], [0], [0], [1], [0, 0, 1, 1], [], []>} : vector<64x64xbf16>, vector<64x32xbf16>, vector<64x32xf32> -> vector<64x32xf32>
    %65 = vector.extract_strided_slice %7 {offsets = [0, 96], sizes = [64, 32], strides = [1, 1]} : vector<64x384xf32> to vector<64x32xf32>
    %66 = arith.truncf %65 : vector<64x32xf32> to vector<64x32xbf16>
    %67 = vector.extract_strided_slice %7 {offsets = [0, 224], sizes = [64, 32], strides = [1, 1]} : vector<64x384xf32> to vector<64x32xf32>
    %68 = arith.truncf %67 : vector<64x32xf32> to vector<64x32xbf16>
    %69 = vector.extract_strided_slice %7 {offsets = [0, 352], sizes = [64, 32], strides = [1, 1]} : vector<64x384xf32> to vector<64x32xf32>
    %70 = arith.truncf %69 : vector<64x32xf32> to vector<64x32xbf16>
    %cst_18 = arith.constant dense<0.000000e+00> : vector<64x64xf32>
    %71 = tpu.matmul %66, %68, %cst_18 {dimension_numbers = #tpu.dot_dimension_numbers<[1], [1], [0], [0], [0, 0, 1, 0], [], []>} : vector<64x32xbf16>, vector<64x32xbf16>, vector<64x64xf32> -> vector<64x64xf32>
    %cst_19 = arith.constant dense<0xFF800000> : vector<64xf32>
    %72 = vector.multi_reduction <maximumf>, %71, %cst_19 [1] : vector<64x64xf32> to vector<64xf32>
    %73 = vector.shape_cast %72 : vector<64xf32> to vector<64x1xf32>
    %74 = vector.broadcast %73 : vector<64x1xf32> to vector<64x64xf32>
    %75 = arith.subf %71, %74 : vector<64x64xf32>
    %76 = math.exp %75 : vector<64x64xf32>
    %cst_20 = arith.constant dense<0.000000e+00> : vector<64xf32>
    %77 = vector.multi_reduction <add>, %76, %cst_20 [1] : vector<64x64xf32> to vector<64xf32>
    %78 = vector.shape_cast %77 : vector<64xf32> to vector<64x1xf32>
    %79 = tpu.reciprocal %78 {approx = true} : vector<64x1xf32> -> vector<64x1xf32>
    %80 = vector.broadcast %79 : vector<64x1xf32> to vector<64x64xf32>
    %81 = arith.mulf %76, %80 : vector<64x64xf32>
    %82 = arith.truncf %81 : vector<64x64xf32> to vector<64x64xbf16>
    %cst_21 = arith.constant dense<0.000000e+00> : vector<64x32xf32>
    %83 = tpu.matmul %82, %70, %cst_21 {dimension_numbers = #tpu.dot_dimension_numbers<[1], [0], [0], [1], [0, 0, 1, 1], [], []>} : vector<64x64xbf16>, vector<64x32xbf16>, vector<64x32xf32> -> vector<64x32xf32>
    %84 = tpu.concatenate %26, %45, %64, %83 in 1 : vector<64x32xf32>, vector<64x32xf32>, vector<64x32xf32>, vector<64x32xf32> -> vector<64x128xf32>
    %85 = arith.truncf %84 : vector<64x128xf32> to vector<64x128xbf16>
    %c0_22 = arith.constant 0 : index
    %c0_23 = arith.constant 0 : index
    %86 = vector.load %arg4[%c0_22, %c0_23] : memref<128x128xbf16, #tpu.memory_space<vmem>>, vector<128x128xbf16>
    %cst_24 = arith.constant dense<0.000000e+00> : vector<64x128xf32>
    %87 = tpu.matmul %85, %86, %cst_24 {dimension_numbers = #tpu.dot_dimension_numbers<[1], [0], [0], [1], [0, 0, 1, 1], [], []>} : vector<64x128xbf16>, vector<128x128xbf16>, vector<64x128xf32> -> vector<64x128xf32>
    %c0_25 = arith.constant 0 : index
    %c0_26 = arith.constant 0 : index
    %88 = vector.load %arg5[%c0_25, %c0_26] : memref<1x128xf32, #tpu.memory_space<vmem>>, vector<1x128xf32>
    %89 = vector.broadcast %88 : vector<1x128xf32> to vector<64x128xf32>
    %90 = arith.addf %87, %89 : vector<64x128xf32>
    %c0_27 = arith.constant 0 : index
    %c0_28 = arith.constant 0 : index
    %c0_29 = arith.constant 0 : index
    %91 = vector.load %arg6[%c0_27, %c0_28, %c0_29] : memref<1x64x128xf32, #tpu.memory_space<vmem>>, vector<1x64x128xf32>
    %92 = vector.shape_cast %91 : vector<1x64x128xf32> to vector<64x128xf32>
    %93 = vector.shape_cast %90 : vector<64x128xf32> to vector<1x64x128xf32>
    tpu.vector_store %arg6[%c0_27, %c0_28, %c0_29], %93 {strides = array<i32>} : memref<1x64x128xf32, #tpu.memory_space<vmem>>, vector<1x64x128xf32>,
    return
  }
  func.func @transform_0(%arg0: i32) -> (i32, i32, i32) {
    %c0_i32 = arith.constant 0 : i32
    %c0_i32_0 = arith.constant 0 : i32
    %c0_i32_1 = arith.constant 0 : i32
    return %arg0, %c0_i32, %c0_i32_0 : i32, i32, i32
  }
  func.func @transform_1(%arg0: i32) -> (i32, i32) {
    %c0_i32 = arith.constant 0 : i32
    %c0_i32_0 = arith.constant 0 : i32
    %c0_i32_1 = arith.constant 0 : i32
    return %c0_i32, %c0_i32_0 : i32, i32
  }
  func.func @transform_2(%arg0: i32) -> (i32, i32) {
    %c0_i32 = arith.constant 0 : i32
    %c0_i32_0 = arith.constant 0 : i32
    %c0_i32_1 = arith.constant 0 : i32
    return %c0_i32, %c0_i32_0 : i32, i32
  }
  func.func @transform_3(%arg0: i32) -> (i32, i32) {
    %c0_i32 = arith.constant 0 : i32
    %c0_i32_0 = arith.constant 0 : i32
    %c0_i32_1 = arith.constant 0 : i32
    return %c0_i32, %c0_i32_0 : i32, i32
  }
  func.func @transform_4(%arg0: i32) -> (i32, i32) {
    %c0_i32 = arith.constant 0 : i32
    %c0_i32_0 = arith.constant 0 : i32
    %c0_i32_1 = arith.constant 0 : i32
    return %c0_i32, %c0_i32_0 : i32, i32
  }
  func.func @transform_5(%arg0: i32) -> (i32, i32, i32) {
    %c0_i32 = arith.constant 0 : i32
    %c0_i32_0 = arith.constant 0 : i32
    %c0_i32_1 = arith.constant 0 : i32
    return %arg0, %c0_i32, %c0_i32_0 : i32, i32, i32
  }
}

</mosaic_0001>

<bundles_post_ra>
// kernel: mul.9
= control target key start
LH: loop header
LB: loop body
LE: loop exit
PB: predicated region body
PF: predicated region fallthrough
CT: control target
= control target key end

     0   :  { %s34_s0 = inlined_call_operand.vmem [shape: f32[384], index: 0, kind: input, shape index: {}]   ;;  %s35_s1 = inlined_call_operand.vmem [shape: f32[384], index: 1, kind: input, shape index: {}]   ;;  %s36_s2 = inlined_call_operand.vmem [shape: f32[384], index: 2, kind: output, shape index: {}]  }
   0x1   :  { %v3_v0 = vld [vmem:[%s34_s0] sm:$0x7] }
   0x2   :  { %v4_v1 = vld [vmem:[%s35_s1] sm:$0x7] }
   0x3   :  { %v7_v2 = vmul.f32 %v4_v1, %v3_v0 }
   0x5   :  { %9 = vst [vmem:[%s36_s2] sm:$0xf] %v7_v2 }

// kernel: attention_forward.1
= control target key start
LH: loop header
LB: loop body
LE: loop exit
PB: predicated region body
PF: predicated region fallthrough
CT: control target
= control target key end

     0   :  { %10 = vsyncpa [#allocation3], 0  ;;  %s3610_s0 = inlined_call_operand.vmem [shape: f32[2,64,128], index: 0, kind: input, shape index: {}]   ;;  %s3611_s1 = inlined_call_operand.vmem [shape: bf16[128,384], index: 1, kind: input, shape index: {}]   ;;  %s3612_s2 = inlined_call_operand.vmem [shape: f32[1,384], index: 2, kind: input, shape index: {}]   ;;  %s3613_s3 = inlined_call_operand.vmem [shape: bf16[128,128], index: 3, kind: input, shape index: {}]   ;;  %s3614_s4 = inlined_call_operand.vmem [shape: f32[1,128], index: 4, kind: input, shape index: {}]   ;;  %s3615_s5 = inlined_call_operand.hbm [shape: f32[2,64,128], index: 5, kind: output, shape index: {}]  }
   0x1   :  { %12 = vsyncpa [#allocation3 + $0x1], 0  ;;  %s2771_s18 = smov 0   ;;  %s2773_s19 = smov 0  }
   0x2   :  { %s2775_s20 = smov 0   ;;  %s2777_s21 = smov 0  }
   0x3 LB: > { %s2792_s22 = sadd.s32 4294967295, %s2732_s21   ;;  %s2038_s23 = sadd.s32 4294967294, %s2732_s21   ;;  %s2732_s21 = sphi %s2777_s21, %s3621_s21   ;;  %s2728_s20 = sphi %s2775_s20, %s3620_s20   ;;  %s2724_s19 = sphi %s2773_s19, %s3619_s19   ;;  %s2720_s18 = sphi %s2771_s18, %s3618_s18  }
   0x4   : > { %s2796_s24 = sadd.s32 1, %s2732_s21   ;;  %s135_s25 = sadd.s32 1, %s2728_s20 }
   0x5   : > { %s132_s26 = ssub.s32 %s2732_s21, %s2796_s24  ;;  %p145_p0 = scmp.ne.s32.totalorder %s2728_s20, %s2724_s19 }
   0x6   : > { %p133_p1 = scmp.eq.s32.totalorder %s132_s26, 0  ;;  %p146_p2 = scmp.eq.s32.totalorder %s2792_s22, 1 }
   0x7   : > { %p151_p3 = scmp.ne.s32.totalorder %s2724_s19, %s2720_s18  ;;  %p152_p4 = scmp.eq.s32.totalorder %s2038_s23, 1 }
   0x8   : > { %s2807_s27 = scalar_select %p133_p1, %s2728_s20, %s135_s25  }
   0x9   : > { %p2809_p5 = por %p146_p2, %p145_p0  ;;  %p2813_p6 = por %p152_p4, %p151_p3 }
   0xa   : > { %p2041_p7 = scmp.ge.s32.totalorder %s2732_s21, 1  ;;  %p190_p8 = scmp.lt.s32.totalorder %s2732_s21, 3 }
   0xc   : > { %p191_p9 = pnand %p2041_p7, %p190_p8 }
   0xd   : > { %v2502_v0 = vld [vmem:[%s3611_s1 + $0x4] ss:$12 sps:$4 sm:$0xff] (!%p191_p9)   ;;  %p218_p10 = scmp.lt.s32.totalorder (!%p191_p9), %s2792_s22, 1  ;;  %v2504_v1 = vld [vmem:[%s3611_s1] ss:$12 sps:$4 sm:$0xff] (!%p191_p9)   ;;  %v2734_v2 = vmov (!%p191_p9), 0   ;;  %v270_v29 = vlaneseq (!%p191_p9) }
   0xe   : > { %194 = sbr.rel (%p191_p9) target bundleno = 2886 (0xb46), region = 40  ;;  %445 = vmatprep.mubr.bf16.mxu0 (!%p191_p9), %v2734_v2  ;;  %413 = vmatprep.subr.bf16.mxu0 (!%p191_p9), %v2502_v0  ;;  %v2505_v3 = vld [vmem:[%s3611_s1 + $0x1c] ss:$12 sps:$4 sm:$0xff] (!%p191_p9)   ;;  %v2507_v4 = vld [vmem:[%s3611_s1 + $0x18] ss:$12 sps:$4 sm:$0xff] (!%p191_p9)   ;;  %vm563_vm0 = vcmask (!%p191_p9), 261120  }
   0xf   : > { %414 = vmatpush1.bf16.msra.mxu0 (!%p191_p9), %v2504_v1  ;;  %v2508_v5 = vld [vmem:[%s3611_s1 + $0x34] ss:$12 sps:$4 sm:$0xff] (!%p191_p9)   ;;  %v2510_v6 = vld [vmem:[%s3611_s1 + $0x30] ss:$12 sps:$4 sm:$0xff] (!%p191_p9)   ;;  %v2511_v7 = vld [vmem:[%s3611_s1 + $0x4c] ss:$12 sps:$4 sm:$0xff] (!%p191_p9)  }
  0x10   : > { %415 = vmatprep.subr.bf16.mxu0 (!%p191_p9), %v2505_v3  ;;  %v2513_v9 = vld [vmem:[%s3611_s1 + $0x48] ss:$12 sps:$4 sm:$0xff] (!%p191_p9)   ;;  %v2514_v11 = vld [vmem:[%s3611_s1 + $0x64] ss:$12 sps:$4 sm:$0xff] (!%p191_p9)   ;;  %v2516_v13 = vld [vmem:[%s3611_s1 + $0x60] ss:$12 sps:$4 sm:$0xff] (!%p191_p9)  }
  0x11   : > { %v2517_v14 = vld [vmem:[%s3611_s1 + $0x7c] ss:$12 sps:$4 sm:$0xff] (!%p191_p9)   ;;  %v2519_v15 = vld [vmem:[%s3611_s1 + $0x78] ss:$12 sps:$4 sm:$0xff] (!%p191_p9)   ;;  %v2520_v16 = vld [vmem:[%s3611_s1 + $0x94] ss:$12 sps:$4 sm:$0xff] (!%p191_p9)  }
  0x12   : > { %v2522_v17 = vld [vmem:[%s3611_s1 + $0x90] ss:$12 sps:$4 sm:$0xff] (!%p191_p9)   ;;  %v2523_v18 = vld [vmem:[%s3611_s1 + $0xac] ss:$12 sps:$4 sm:$0xff] (!%p191_p9)   ;;  %v2525_v19 = vld [vmem:[%s3611_s1 + $0xa8] ss:$12 sps:$4 sm:$0xff] (!%p191_p9)  }
  0x13   : > { %416 = vmatpush1.bf16.msra.mxu0 (!%p191_p9), %v2507_v4  ;;  %v2891_v30 = vshrl.u32 (!%p191_p9), %v270_v29, 7  ;;  %v2897_v32 = vld [vmem:[%s3612_s2] sm:$0x7] (!%p191_p9)  ;;  %vm653_vm1 = vcmask (!%p191_p9), 523264   ;;  %s2736_s13 = smov (!%p191_p9), 64   ;;  %s2737_s14 = smov (!%p191_p9), 32  }
  0x14   : > { %417 = vmatprep.subr.bf16.mxu0 (!%p191_p9), %v2508_v5  ;;  %vm1805_vm2 = vcmask (!%p191_p9), 785408   ;;  %s2116_s26 = sshll.u32 (!%p191_p9), %s2792_s22, 10 }
  0x15   : > { %s219_s11 = scalar_select %p218_p10, %s2792_s22, 1  ;;  %v272_v31 = vsub.s32 0, %v2891_v30  ;;  %v276_v33 = vsub.s32 1, %v2891_v30 }
  0x16   : > { %s3563_s9 = scalar_lea.hbm %s3615_s5, %s2116_s26 }
  0x17   : > { %s2115_s16 = sshll.u32 %s219_s11, 6  ;;  %418 = vmatpush1.bf16.msra.mxu0 %v2510_v6  ;;  %v273_v34 = vrot.slane %v2897_v32, %v272_v31  ;;  %v277_v36 = vrot.slane %v2897_v32, %v276_v33  ;;  %s2738_s11 = smov [#allocation2]  }
  0x18   : > { %s2842_s30 = scalar_lea.vmem %s3610_s0, %s2115_s16  ;;  %419 = vmatprep.subr.bf16.mxu0 %v2511_v7  ;;  %s2674_s12 = sshll.u32 %s2738_s11, 4  ;;  %s2675_s12 = int_to_ptr.vmem [resolvable:$false] %s2674_s12 }
  0x19   : > { %v224_v8 = vld [vmem:[%s2842_s30] sm:$0xff]  ;;  %v225_v10 = vld [vmem:[%s2842_s30 + $0x8] sm:$0xff]  ;;  %v226_v20 = vld [vmem:[%s2842_s30 + $0x10] sm:$0xff] }
  0x1a   : > { %v232_v12 = vpack.c.bf16 %v225_v10, %v224_v8  ;;  %v227_v21 = vld [vmem:[%s2842_s30 + $0x18] sm:$0xff]  ;;  %v228_v23 = vld [vmem:[%s2842_s30 + $0x20] sm:$0xff]  ;;  %v229_v24 = vld [vmem:[%s2842_s30 + $0x28] sm:$0xff] }
  0x1b   : > { %420 = vmatpush1.bf16.msra.mxu0 %v2513_v9  ;;  %v2878_v22 = vpack.c.bf16 %v227_v21, %v226_v20  ;;  %v2883_v25 = vpack.c.bf16 %v229_v24, %v228_v23  ;;  %v230_v26 = vld [vmem:[%s2842_s30 + $0x30] sm:$0xff]  ;;  %v231_v27 = vld [vmem:[%s2842_s30 + $0x38] sm:$0xff]  ;;  %v2531_v21 = vld [vmem:[%s3611_s1 + $0x80] ss:$12 sps:$4 sm:$0xff]   ;;  %s2735_s30 = smov 96  }
  0x1c   : > { %2221 = vmatprep.mubr.bf16.mxu1 %v232_v12  ;;  %421 = vmatprep.subr.bf16.mxu0 %v2514_v11  ;;  %v2888_v28 = vpack.c.bf16 %v231_v27, %v230_v26  ;;  %v2530_v20 = vld [vmem:[%s3611_s1 + $0x68] ss:$12 sps:$4 sm:$0xff]   ;;  %v2532_v23 = vld [vmem:[%s3611_s1 + $0x98] ss:$12 sps:$4 sm:$0xff]   ;;  %v2533_v24 = vld [vmem:[%s3611_s1 + $0xb0] ss:$12 sps:$4 sm:$0xff]  }
  0x1f   : > { %422 = vmatpush1.bf16.msra.mxu0 %v2516_v13 }
  0x20   : > { %423 = vmatprep.subr.bf16.mxu0 %v2517_v14 }
  0x23   : > { %424 = vmatpush1.bf16.msra.mxu0 %v2519_v15 }
  0x24   : > { %425 = vmatprep.subr.bf16.mxu0 %v2520_v16  ;;  %v2526_v16 = vld [vmem:[%s3611_s1 + $0x8] ss:$12 sps:$4 sm:$0xff]  }
  0x25   : > { %2205 = vmatprep.subr.bf16.mxu1 %v2526_v16 }
  0x26   : > { %2206 = vmatpush3.bf16.msra.mxu1 %v2526_v16 }
  0x27   : > { %426 = vmatpush1.bf16.msra.mxu0 %v2522_v17  ;;  %v2527_v17 = vld [vmem:[%s3611_s1 + $0x20] ss:$12 sps:$4 sm:$0xff]  }
  0x28   : > { %427 = vmatprep.subr.bf16.mxu0 %v2523_v18  ;;  %2207 = vmatprep.subr.bf16.mxu1 %v2527_v17  ;;  %v2528_v18 = vld [vmem:[%s3611_s1 + $0x38] ss:$12 sps:$4 sm:$0xff]  }
  0x2a   : > { %2208 = vmatpush3.bf16.msra.mxu1 %v2527_v17 }
  0x2b   : > { %428 = vmatpush1.bf16.msra.mxu0 %v2525_v19  ;;  %2209 = vmatprep.subr.bf16.mxu1 %v2528_v18  ;;  %v2529_v19 = vld [vmem:[%s3611_s1 + $0x50] ss:$12 sps:$4 sm:$0xff]  }
  0x2e   : > { %446 = vmatmul.mubr.bf16.vlgmr.msra.gmra.mrb[0].mxu0 %v232_v12  ;;  %2210 = vmatpush3.bf16.msra.mxu1 %v2528_v18 }
  0x2f   : > { %455 = vmatprep.mubr.bf16.mxu0 %v2734_v2  ;;  %2211 = vmatprep.subr.bf16.mxu1 %v2529_v19 }
  0x32   : > { %2212 = vmatpush3.bf16.msra.mxu1 %v2529_v19 }
  0x33   : > { %2213 = vmatprep.subr.bf16.mxu1 %v2530_v20 }
  0x36   : > { %456 = vmatmul.mubr.bf16.gmra.mrb[4].mxu0 %v2878_v22  ;;  %2214 = vmatpush3.bf16.msra.mxu1 %v2530_v20 }
  0x37   : > { %465 = vmatprep.mubr.bf16.mxu0 %v2734_v2  ;;  %2215 = vmatprep.subr.bf16.mxu1 %v2531_v21 }
  0x3a   : > { %2216 = vmatpush3.bf16.msra.mxu1 %v2531_v21 }
  0x3b   : > { %2217 = vmatprep.subr.bf16.mxu1 %v2532_v23 }
  0x3e   : > { %466 = vmatmul.mubr.bf16.gmra.mrb[8].mxu0 %v2883_v25  ;;  %2218 = vmatpush3.bf16.msra.mxu1 %v2532_v23 }
  0x3f   : > { %475 = vmatprep.mubr.bf16.mxu0 %v2734_v2  ;;  %2219 = vmatprep.subr.bf16.mxu1 %v2533_v24 }
  0x42   : > { %2220 = vmatpush3.bf16.msra.mxu1 %v2533_v24 }
  0x45   : > { %2222 = vmatmul.mubr.bf16.vlgmr.msra.gmra.mrb[0].mxu1 %v2878_v22 }
  0x46   : > { %476 = vmatmul.mubr.bf16.gmra.mrb[12].mxu0 %v2888_v28  ;;  %2225 = vmatprep.mubr.bf16.mxu1 %v2883_v25 }
  0x4d   : > { %2226 = vmatmul.mubr.bf16.gmra.mrb[4].mxu1 %v2888_v28 }
 0x101   : > { %v447_v35 = vpop.f32.mrb[0].mxu0 }
 0x102   : > { %v449_v37 = vpop.f32.mrb[1].mxu0  ;;  %v448_v39 = vadd.f32 %v447_v35, %v273_v34 }
 0x103   : > { %v451_v38 = vpop.f32.mrb[2].mxu0  ;;  %v450_v42 = vadd.f32 %v449_v37, %v277_v36 }
 0x104   : > { %v452_v40 = vadd.f32 %v451_v38, %v273_v34  ;;  %v453_v41 = vpop.f32.mrb[3].mxu0 }
 0x105   : > { %v454_v43 = vadd.f32 %v453_v41, %v277_v36 }
 0x106   : > { %v2902_v44 = vpack.c.bf16 %v452_v40, %v448_v39 }
 0x107   : > { %v2904_v45 = vpack.c.bf16 %v454_v43, %v450_v42 }
 0x108   : > { %2237 = vmatprep.mubr.msk.bf16.mxu0 %vm563_vm0, %v2902_v44 }
 0x109   : > { %v457_v46 = vpop.f32.mrb[4].mxu0  ;;  %2381 = vmatprep.subr.msk.bf16.mxu0 %vm563_vm0, %v2904_v45  ;;  %v577_v47 = vsel %vm563_vm0, %v2904_v45, 0 }
 0x10a   : > { %v459_v48 = vpop.f32.mrb[5].mxu0  ;;  %2230 = vmatpush3.bf16.xpose.msra.mxu0 %v577_v47  ;;  %v458_v50 = vadd.f32 %v457_v46, %v273_v34 }
 0x10b   : > { %v461_v49 = vpop.f32.mrb[6].mxu0  ;;  %v460_v53 = vadd.f32 %v459_v48, %v277_v36 }
 0x10c   : > { %v462_v51 = vadd.f32 %v461_v49, %v273_v34  ;;  %v463_v52 = vpop.f32.mrb[7].mxu0 }
 0x10d   : > { %v464_v54 = vadd.f32 %v463_v52, %v277_v36 }
 0x10e   : > { %v2912_v55 = vpack.c.bf16 %v462_v51, %v458_v50 }
 0x10f   : > { %v2914_v56 = vpack.c.bf16 %v464_v54, %v460_v53  ;;  %v280_v53 = vsub.s32 2, %v2891_v30 }
 0x111   : > { %v467_v57 = vpop.f32.mrb[8].mxu0  ;;  %2382 = vmatprep.subr.msk.bf16.mxu0 %vm563_vm0, %v2914_v56  ;;  %v580_v58 = vsel %vm563_vm0, %v2914_v56, 0 }
 0x112   : > { %v469_v59 = vpop.f32.mrb[9].mxu0  ;;  %2232 = vmatpush3.bf16.xpose.msra.mxu0 %v580_v58  ;;  %v468_v61 = vadd.f32 %v467_v57, %v273_v34 }
 0x113   : > { %v471_v60 = vpop.f32.mrb[10].mxu0  ;;  %v470_v0 = vadd.f32 %v469_v59, %v277_v36  ;;  %v281_v59 = vrot.slane %v2897_v32, %v280_v53 }
 0x114   : > { %v472_v62 = vadd.f32 %v471_v60, %v273_v34  ;;  %v473_v63 = vpop.f32.mrb[11].mxu0 }
 0x115   : > { %v474_v1 = vadd.f32 %v473_v63, %v277_v36 }
 0x116   : > { %v2920_v2 = vpack.c.bf16 %v472_v62, %v468_v61 }
 0x117   : > { %v2922_v3 = vpack.c.bf16 %v474_v1, %v470_v0 }
 0x118   : > { %v2223_v60 = vpop.f32.mrb[0].mxu1 }
 0x119   : > { %v477_v4 = vpop.f32.mrb[12].mxu0  ;;  %2383 = vmatprep.subr.msk.bf16.mxu0 %vm563_vm0, %v2922_v3  ;;  %v583_v5 = vsel %vm563_vm0, %v2922_v3, 0  ;;  %v529_v61 = vadd.f32 %v2223_v60, %v281_v59  ;;  %v520_v62 = vpop.f32.mrb[1].mxu1 }
 0x11a   : > { %v479_v6 = vpop.f32.mrb[13].mxu0  ;;  %2234 = vmatpush3.bf16.xpose.msra.mxu0 %v583_v5  ;;  %v478_v8 = vadd.f32 %v477_v4, %v273_v34  ;;  %v521_v63 = vadd.f32 %v520_v62, %v281_v59  ;;  %v2224_v0 = vpop.f32.mrb[2].mxu1 }
 0x11b   : > { %v481_v7 = vpop.f32.mrb[14].mxu0  ;;  %v480_v11 = vadd.f32 %v479_v6, %v277_v36  ;;  %v532_v1 = vadd.f32 %v2224_v0, %v281_v59  ;;  %v523_v4 = vpop.f32.mrb[3].mxu1 }
 0x11c   : > { %v482_v9 = vadd.f32 %v481_v7, %v273_v34  ;;  %v483_v10 = vpop.f32.mrb[15].mxu0  ;;  %v524_v6 = vadd.f32 %v523_v4, %v281_v59 }
 0x11d   : > { %v484_v12 = vadd.f32 %v483_v10, %v277_v36  ;;  %v2999_v7 = vpack.c.bf16 %v532_v1, %v529_v61 }
 0x11e   : > { %v2928_v13 = vpack.c.bf16 %v482_v9, %v478_v8  ;;  %v3003_v32 = vpack.c.bf16 %v524_v6, %v521_v63 }
 0x11f   : > { %v2930_v14 = vpack.c.bf16 %v484_v12, %v480_v11 }
 0x120   : > { %v2227_v10 = vpop.f32.mrb[4].mxu1  ;;  %2245 = vmatprep.subr.bf16.mxu1 %v3003_v32 }
 0x121   : > { %2384 = vmatprep.subr.msk.bf16.mxu0 %vm563_vm0, %v2930_v14  ;;  %v586_v15 = vsel %vm563_vm0, %v2930_v14, 0  ;;  %v536_v16 = vpop.f32.mrb[5].mxu1  ;;  %2246 = vmatpush3.bf16.msra.mxu1 %v3003_v32 }
 0x122   : > { %2236 = vmatpush3.bf16.xpose.msra.mxu0 %v586_v15  ;;  %v545_v15 = vadd.f32 %v2227_v10, %v281_v59  ;;  %v537_v18 = vadd.f32 %v536_v16, %v281_v59  ;;  %v2228_v19 = vpop.f32.mrb[6].mxu1  ;;  %2247 = vmatprep.subr.bf16.mxu1 %v2999_v7 }
 0x123   : > { %v548_v20 = vadd.f32 %v2228_v19, %v281_v59  ;;  %v539_v21 = vpop.f32.mrb[7].mxu1 }
 0x124   : > { %v540_v23 = vadd.f32 %v539_v21, %v281_v59 }
 0x125   : > { %2248 = vmatpush3.bf16.msra.mxu1 %v2999_v7 }
 0x129   : > { %2238 = vmatmul.mubr.msk.bf16.vlgmr.msra.gmra.mrb[16].mxu0 %vm563_vm0, %v2912_v55 }
 0x12a   : > { %2241 = vmatprep.mubr.msk.bf16.mxu0 %vm563_vm0, %v2920_v2 }
 0x131   : > { %2242 = vmatmul.mubr.msk.bf16.gmra.mrb[20].mxu0 %vm563_vm0, %v2928_v13 }
 0x1fc   : > { %v2239_v26 = vpop.f32.mrb[16].mxu0 }
 0x1fd   : > { %v622_v27 = vpop.f32.mrb[17].mxu0  ;;  %v660_v29 = vsel %vm653_vm1, %v2239_v26, -inf }
 0x1fe   : > { %661 = vmax.xlane.f32.xlu1 %v660_v29  ;;  %v2240_v31 = vpop.f32.mrb[18].mxu0  ;;  %v654_v33 = vsel %vm653_vm1, %v622_v27, -inf }
 0x1ff   : > { %655 = vmax.xlane.f32.xlu0 %v654_v33  ;;  %v625_v34 = vpop.f32.mrb[19].mxu0  ;;  %v663_v35 = vsel %vm653_vm1, %v2240_v31, -inf }
 0x200   : > { %v657_v22 = vsel %vm653_vm1, %v625_v34, -inf }
 0x202   : > { %664 = vmax.xlane.f32.xlu1 %v663_v35 }
 0x203   : > { %658 = vmax.xlane.f32.xlu0 %v657_v22 }
 0x204   : > { %v2973_v25 = vpop.f32.mrb[20].mxu0 }
 0x205   : > { %v2975_v28 = vpop.f32.mrb[21].mxu0  ;;  %v672_v40 = vsel %vm653_vm1, %v2973_v25, -inf }
 0x206   : > { %v2977_v36 = vpop.f32.mrb[22].mxu0  ;;  %v666_v37 = vsel %vm653_vm1, %v2975_v28, -inf }
 0x207   : > { %667 = vmax.xlane.f32.xlu0 %v666_v37  ;;  %v2981_v38 = vpop.f32.mrb[23].mxu0  ;;  %v675_v39 = vsel %vm653_vm1, %v2977_v36, -inf }
 0x208   : > { %676 = vmax.xlane.f32.xlu1 %v675_v39  ;;  %v669_v41 = vsel %vm653_vm1, %v2981_v38, -inf }
 0x20b   : > { %673 = vmax.xlane.f32.xlu0 %v672_v40 }
 0x20c   : > { %670 = vmax.xlane.f32.xlu1 %v669_v41 }
 0x21d   : > { %841 = vrot.lane.b32.xlu1 %v2914_v56, %s2735_s30 }
 0x221   : > { %843 = vrot.lane.b32.xlu1 %v2922_v3, %s2735_s30 }
 0x28b   : > { %v662_v42 = vpop.xlane.xlu1 %661 }
 0x28c   : > { %v680_v43 = vsub.f32 %v2239_v26, %v662_v42  ;;  %v656_v46 = vpop.xlane.xlu0 %655  ;;  %v3018_v26 = vpack.c.bf16 %v548_v20, %v545_v15 }
 0x28d   : > { %v678_v47 = vsub.f32 %v622_v27, %v656_v46  ;;  %v3021_v27 = vpack.c.bf16 %v540_v23, %v537_v18 }
 0x28e   : > { %v690_v48 = vmul.f32 1.442695, %v680_v43 }
 0x28f   : > { %v686_v49 = vmul.f32 1.442695, %v678_v47  ;;  %v665_v50 = vpop.xlane.xlu1 %664  ;;  %2249 = vmatprep.subr.bf16.mxu1 %v3021_v27 }
 0x290   : > { %2542 = vpow2.f32 %v690_v48  ;;  %v681_v51 = vsub.f32 %v2240_v31, %v665_v50  ;;  %v659_v52 = vpop.xlane.xlu0 %658  ;;  %2250 = vmatpush3.bf16.msra.mxu1 %v3021_v27 }
 0x291   : > { %v679_v54 = vsub.f32 %v625_v34, %v659_v52  ;;  %2544 = vpow2.f32 %v686_v49  ;;  %2251 = vmatprep.subr.bf16.mxu1 %v3018_v26 }
 0x292   : > { %v692_v57 = vmul.f32 1.442695, %v681_v51 }
 0x293   : > { %v688_v58 = vmul.f32 1.442695, %v679_v54 }
 0x294   : > { %2546 = vpow2.f32 %v692_v57  ;;  %2252 = vmatpush3.bf16.msra.mxu1 %v3018_v26  ;;  %v668_v29 = vpop.xlane.xlu0 %667 }
 0x295   : > { %2548 = vpow2.f32 %v688_v58  ;;  %v677_v33 = vpop.xlane.xlu1 %676  ;;  %v682_v35 = vsub.f32 %v2975_v28, %v668_v29 }
 0x296   : > { %v685_v22 = vsub.f32 %v2977_v36, %v677_v33 }
 0x297   : > { %v694_v40 = vmul.f32 1.442695, %v682_v35 }
 0x298   : > { %v674_v31 = vpop.xlane.xlu0 %673  ;;  %v700_v41 = vmul.f32 1.442695, %v685_v22 }
 0x299   : > { %v684_v34 = vsub.f32 %v2973_v25, %v674_v31  ;;  %v671_v39 = vpop.xlane.xlu1 %670 }
 0x29a   : > { %v2995_v5 = vpop.eup %2542  ;;  %v683_v42 = vsub.f32 %v2981_v38, %v671_v39 }
 0x29b   : > { %v708_v30 = vsel %vm653_vm1, %v2995_v5, 0.0  ;;  %v3001_v8 = vpop.eup %2544  ;;  %v698_v37 = vmul.f32 1.442695, %v684_v34 }
 0x29c   : > { %709 = vadd.xlane.f32.xlu0 %v708_v30  ;;  %v702_v11 = vsel %vm653_vm1, %v3001_v8, 0.0  ;;  %v696_v43 = vmul.f32 1.442695, %v683_v42 }
 0x29d   : > { %2550 = vpow2.f32 %v698_v37  ;;  %v842_v50 = vpop.permute.xlu1 %841 }
 0x29e   : > { %v3005_v9 = vpop.eup %2546  ;;  %2552 = vpow2.f32 %v694_v40  ;;  %v863_v15 = vsel %vm563_vm0, %v842_v50, 0 }
 0x29f   : > { %v711_v12 = vsel %vm653_vm1, %v3005_v9, 0.0  ;;  %v3013_v17 = vpop.eup %2548  ;;  %2554 = vpow2.f32 %v700_v41 }
 0x2a0   : > { %703 = vadd.xlane.f32.xlu0 %v702_v11  ;;  %712 = vadd.xlane.f32.xlu1 %v711_v12  ;;  %v705_v24 = vsel %vm653_vm1, %v3013_v17, 0.0  ;;  %2556 = vpow2.f32 %v696_v43 }
 0x2a1   : > { %v844_v51 = vpop.permute.xlu1 %843 }
 0x2a4   : > { %706 = vadd.xlane.f32.xlu1 %v705_v24 }
 0x2a7   : > { %v3035_v46 = vpop.eup %2550 }
 0x2a8   : > { %v3037_v47 = vpop.eup %2552  ;;  %v720_v25 = vsel %vm653_vm1, %v3035_v46, 0.0 }
 0x2a9   : > { %v3041_v28 = vpop.eup %2554  ;;  %v714_v36 = vsel %vm653_vm1, %v3037_v47, 0.0 }
 0x2aa   : > { %v723_v38 = vsel %vm653_vm1, %v3041_v28, 0.0  ;;  %v3047_v48 = vpop.eup %2556 }
 0x2ab   : > { %v717_v49 = vsel %vm653_vm1, %v3047_v48, 0.0 }
 0x2b5   : > { %1129 = vrot.lane.b32.xlu1 %v2904_v45, %s2736_s13 }
 0x2b6   : > { %839 = vrot.lane.b32.xlu0 %v2904_v45, %s2735_s30 }
 0x2d5   : > { %721 = vadd.xlane.f32.xlu0 %v720_v25 }
 0x2d9   : > { %715 = vadd.xlane.f32.xlu0 %v714_v36  ;;  %724 = vadd.xlane.f32.xlu1 %v723_v38 }
 0x2dd   : > { %718 = vadd.xlane.f32.xlu1 %v717_v49 }
 0x2ee   : > { %1131 = vrot.lane.b32.xlu1 %v2914_v56, %s2736_s13 }
 0x2ef   : > { %845 = vrot.lane.b32.xlu0 %v2930_v14, %s2735_s30 }
 0x2f2   : > { %829 = vrot.lane.b32.xlu1 %v2912_v55, %s2735_s30 }
 0x2f3   : > { %827 = vrot.lane.b32.xlu0 %v2902_v44, %s2735_s30 }
 0x2f6   : > { %831 = vrot.lane.b32.xlu1 %v2920_v2, %s2735_s30 }
 0x2f7   : > { %1133 = vrot.lane.b32.xlu0 %v2922_v3, %s2736_s13 }
 0x2fa   : > { %1135 = vrot.lane.b32.xlu1 %v2930_v14, %s2736_s13 }
 0x2fb   : > { %833 = vrot.lane.b32.xlu0 %v2928_v13, %s2735_s30 }
 0x2fe   : > { %1123 = vrot.lane.b32.xlu1 %v2912_v55, %s2736_s13 }
 0x2ff   : > { %1121 = vrot.lane.b32.xlu0 %v2902_v44, %s2736_s13 }
 0x302   : > { %1127 = vrot.lane.b32.xlu1 %v2928_v13, %s2736_s13 }
 0x303   : > { %1125 = vrot.lane.b32.xlu0 %v2920_v2, %s2736_s13 }
 0x329   : > { %v710_v52 = vpop.xlane.xlu0 %709 }
 0x32d   : > { %v704_v53 = vpop.xlane.xlu0 %703  ;;  %v713_v54 = vpop.xlane.xlu1 %712 }
 0x32e   : > { %2558 = vrcp.f32 %v713_v54 }
 0x32f   : > { %2560 = vrcp.f32 %v704_v53 }
 0x330   : > { %2562 = vrcp.f32 %v710_v52 }
 0x331   : > { %v840_v57 = vpop.permute.xlu0 %839  ;;  %v707_v58 = vpop.xlane.xlu1 %706 }
 0x332   : > { %2564 = vrcp.f32 %v707_v58  ;;  %2385 = vmatprep.subr.msk.bf16.mxu1 %vm563_vm0, %v840_v57  ;;  %v860_v12 = vsel %vm563_vm0, %v840_v57, 0 }
 0x335   : > { %v1130_v59 = vpop.permute.xlu1 %1129 }
 0x336   : > { %v1150_v60 = vsel %vm563_vm0, %v1130_v59, 0  ;;  %2389 = vmatprep.subr.msk.bf16.mxu0 %vm563_vm0, %v1130_v59 }
 0x337   : > { %2294 = vmatpush3.bf16.xpose.msra.mxu0 %v1150_v60 }
 0x338   : > { %v2559_v61 = vpop.eup %2558 }
 0x339   : > { %v2561_v62 = vpop.eup %2560  ;;  %v737_v1 = vmul.f32 %v2559_v61, %v3005_v9 }
 0x33a   : > { %v2563_v63 = vpop.eup %2562  ;;  %v734_v4 = vmul.f32 %v2561_v62, %v3001_v8  ;;  %v866_v8 = vsel %vm563_vm0, %v844_v51, 0 }
 0x33b   : > { %v736_v30 = vmul.f32 %v2563_v63, %v2995_v5 }
 0x33c   : > { %v2565_v0 = vpop.eup %2564 }
 0x33d   : > { %v735_v6 = vmul.f32 %v2565_v0, %v3013_v17  ;;  %v743_v11 = vpack.c.bf16 %v737_v1, %v736_v30 }
 0x33f   : > { %v742_v10 = vpack.c.bf16 %v735_v6, %v734_v4 }
 0x341   : > { %2253 = vmatprep.mubr.msk.bf16.mxu1 %vm653_vm1, %v742_v10 }
 0x342   : > { %2254 = vmatmul.mubr.msk.bf16.vlgmr.msra.gmra.mrb[8].mxu1 %vm653_vm1, %v743_v11 }
 0x343   : > { %2262 = vmatpush3.bf16.xpose.msra.mxu1 %v860_v12 }
 0x344   : > { %2386 = vmatprep.subr.msk.bf16.mxu1 %vm563_vm0, %v842_v50 }
 0x34b   : > { %2264 = vmatpush3.bf16.xpose.msra.mxu1 %v863_v15 }
 0x34c   : > { %2387 = vmatprep.subr.msk.bf16.mxu1 %vm563_vm0, %v844_v51 }
 0x353   : > { %2266 = vmatpush3.bf16.xpose.msra.mxu1 %v866_v8 }
 0x362   : > { %v722_v5 = vpop.xlane.xlu0 %721 }
 0x366   : > { %v716_v9 = vpop.xlane.xlu0 %715  ;;  %v725_v16 = vpop.xlane.xlu1 %724 }
 0x367   : > { %2566 = vrcp.f32 %v725_v16 }
 0x368   : > { %2568 = vrcp.f32 %v716_v9 }
 0x369   : > { %2570 = vrcp.f32 %v722_v5 }
 0x36a   : > { %v846_v17 = vpop.permute.xlu0 %845  ;;  %v719_v18 = vpop.xlane.xlu1 %718 }
 0x36b   : > { %v869_v19 = vsel %vm563_vm0, %v846_v17, 0  ;;  %2572 = vrcp.f32 %v719_v18  ;;  %2388 = vmatprep.subr.msk.bf16.mxu1 %vm563_vm0, %v846_v17 }
 0x36c   : > { %2268 = vmatpush3.bf16.xpose.msra.mxu1 %v869_v19 }
 0x36e   : > { %v828_v20 = vpop.permute.xlu0 %827  ;;  %v1132_v21 = vpop.permute.xlu1 %1131 }
 0x36f   : > { %v1153_v23 = vsel %vm563_vm0, %v1132_v21, 0  ;;  %2390 = vmatprep.subr.msk.bf16.mxu0 %vm563_vm0, %v1132_v21 }
 0x370   : > { %2296 = vmatpush3.bf16.xpose.msra.mxu0 %v1153_v23 }
 0x371   : > { %v2567_v24 = vpop.eup %2566 }
 0x372   : > { %v1134_v29 = vpop.permute.xlu0 %1133  ;;  %v830_v31 = vpop.permute.xlu1 %829  ;;  %v741_v22 = vmul.f32 %v2567_v24, %v3041_v28 }
 0x373   : > { %v2569_v33 = vpop.eup %2568  ;;  %2391 = vmatprep.subr.msk.bf16.mxu0 %vm563_vm0, %v1134_v29  ;;  %v1156_v42 = vsel %vm563_vm0, %v1134_v29, 0 }
 0x374   : > { %v2571_v34 = vpop.eup %2570  ;;  %v738_v40 = vmul.f32 %v2569_v33, %v3037_v47 }
 0x375   : > { %v2573_v35 = vpop.eup %2572  ;;  %v740_v43 = vmul.f32 %v2571_v34, %v3035_v46 }
 0x376   : > { %v834_v37 = vpop.permute.xlu0 %833  ;;  %v832_v39 = vpop.permute.xlu1 %831  ;;  %v739_v41 = vmul.f32 %v2573_v35, %v3047_v48 }
 0x377   : > { %v745_v36 = vpack.c.bf16 %v741_v22, %v740_v43 }
 0x378   : > { %2298 = vmatpush3.bf16.xpose.msra.mxu0 %v1156_v42  ;;  %v744_v25 = vpack.c.bf16 %v739_v41, %v738_v40 }
 0x37a   : > { %v1122_v38 = vpop.permute.xlu0 %1121  ;;  %2257 = vmatprep.mubr.msk.bf16.mxu1 %vm653_vm1, %v744_v25  ;;  %v1136_v49 = vpop.permute.xlu1 %1135 }
 0x37b   : > { %2258 = vmatmul.mubr.msk.bf16.gmra.mrb[12].mxu1 %vm653_vm1, %v745_v36  ;;  %2392 = vmatprep.subr.msk.bf16.mxu0 %vm563_vm0, %v1136_v49  ;;  %v1159_v47 = vsel %vm563_vm0, %v1136_v49, 0 }
 0x37c   : > { %2301 = vmatprep.mubr.msk.bf16.mxu0 %vm563_vm0, %v1122_v38  ;;  %2269 = vmatprep.mubr.msk.bf16.mxu1 %vm563_vm0, %v828_v20 }
 0x37e   : > { %v1124_v46 = vpop.permute.xlu1 %1123  ;;  %v1126_v28 = vpop.permute.xlu0 %1125 }
 0x380   : > { %2300 = vmatpush3.bf16.xpose.msra.mxu0 %v1159_v47 }
 0x382   : > { %v1128_v48 = vpop.permute.xlu1 %1127 }
 0x383   : > { %2270 = vmatmul.mubr.msk.bf16.vlgmr.msra.gmra.mrb[16].mxu1 %vm563_vm0, %v830_v31 }
 0x384   : > { %2273 = vmatprep.mubr.msk.bf16.mxu1 %vm563_vm0, %v832_v39 }
 0x387   : > { %2302 = vmatmul.mubr.msk.bf16.vlgmr.msra.gmra.mrb[24].mxu0 %vm563_vm0, %v1124_v46 }
 0x388   : > { %2305 = vmatprep.mubr.msk.bf16.mxu0 %vm563_vm0, %v1126_v28 }
 0x38b   : > { %2274 = vmatmul.mubr.msk.bf16.gmra.mrb[20].mxu1 %vm563_vm0, %v834_v37 }
 0x38f   : > { %2306 = vmatmul.mubr.msk.bf16.gmra.mrb[28].mxu0 %vm563_vm0, %v1128_v48 }
 0x415   : > { %v3111_v50 = vpop.f32.mrb[8].mxu1 }
 0x416   : > { %v3113_v51 = vpop.f32.mrb[9].mxu1 }
 0x417   : > { %v3115_v52 = vpop.f32.mrb[10].mxu1 }
 0x418   : > { %v3117_v53 = vpop.f32.mrb[11].mxu1 }
 0x44e   : > { %v3119_v54 = vpop.f32.mrb[12].mxu1 }
 0x44f   : > { %v3121_v57 = vpop.f32.mrb[13].mxu1 }
 0x450   : > { %v3123_v58 = vpop.f32.mrb[14].mxu1 }
 0x451   : > { %v3125_v59 = vpop.f32.mrb[15].mxu1 }
 0x456   : > { %v3127_v60 = vpop.f32.mrb[16].mxu1 }
 0x457   : > { %v3129_v61 = vpop.f32.mrb[17].mxu1  ;;  %v942_v29 = vsel %vm653_vm1, %v3127_v60, -inf }
 0x458   : > { %v3131_v62 = vpop.f32.mrb[18].mxu1  ;;  %v936_v33 = vsel %vm653_vm1, %v3129_v61, -inf }
 0x459   : > { %v3133_v63 = vpop.f32.mrb[19].mxu1  ;;  %v945_v34 = vsel %vm653_vm1, %v3131_v62, -inf }
 0x45a   : > { %v2303_v0 = vpop.f32.mrb[24].mxu0  ;;  %v939_v31 = vsel %vm653_vm1, %v3133_v63, -inf }
 0x45b   : > { %v1195_v1 = vpop.f32.mrb[25].mxu0  ;;  %v1232_v8 = vsel %vm653_vm1, %v2303_v0, -inf }
 0x45c   : > { %v2304_v4 = vpop.f32.mrb[26].mxu0  ;;  %v1226_v6 = vsel %vm653_vm1, %v1195_v1, -inf }
 0x45d   : > { %1227 = vmax.xlane.f32.xlu0 %v1226_v6  ;;  %v1198_v30 = vpop.f32.mrb[27].mxu0  ;;  %v1235_v16 = vsel %vm653_vm1, %v2304_v4, -inf }
 0x45e   : > { %v3136_v10 = vpop.f32.mrb[20].mxu1  ;;  %v1229_v11 = vsel %vm653_vm1, %v1198_v30, -inf }
 0x45f   : > { %v3139_v12 = vpop.f32.mrb[21].mxu1  ;;  %1230 = vmax.xlane.f32.xlu1 %v1229_v11  ;;  %v954_v35 = vsel %vm653_vm1, %v3136_v10, -inf }
 0x460   : > { %v3141_v15 = vpop.f32.mrb[22].mxu1  ;;  %v948_v22 = vsel %vm653_vm1, %v3139_v12, -inf }
 0x461   : > { %v3144_v5 = vpop.f32.mrb[23].mxu1  ;;  %1233 = vmax.xlane.f32.xlu0 %v1232_v8 }
 0x462   : > { %v3146_v9 = vpop.f32.mrb[28].mxu0 }
 0x463   : > { %1236 = vmax.xlane.f32.xlu1 %v1235_v16  ;;  %v3149_v17 = vpop.f32.mrb[29].mxu0  ;;  %v1244_v23 = vsel %vm653_vm1, %v3146_v9, -inf }
 0x464   : > { %v3151_v18 = vpop.f32.mrb[30].mxu0  ;;  %v1238_v19 = vsel %vm653_vm1, %v3149_v17, -inf }
 0x465   : > { %1239 = vmax.xlane.f32.xlu0 %v1238_v19  ;;  %v3155_v20 = vpop.f32.mrb[31].mxu0  ;;  %v1247_v24 = vsel %vm653_vm1, %v3151_v18, -inf }
 0x466   : > { %v1241_v21 = vsel %vm653_vm1, %v3155_v20, -inf }
 0x467   : > { %1242 = vmax.xlane.f32.xlu1 %v1241_v21 }
 0x469   : > { %1245 = vmax.xlane.f32.xlu0 %v1244_v23 }
 0x46b   : > { %1248 = vmax.xlane.f32.xlu1 %v1247_v24 }
 0x47c   : > { %1034 = vrot.lane.b32.xlu1 %v2999_v7, %s2735_s30 }
 0x47f   : > { %1032 = vrot.lane.b32.xlu0 %v3003_v32, %s2735_s30 }
 0x49e   : > { %943 = vmax.xlane.f32.xlu0 %v942_v29 }
 0x4a0   : > { %940 = vmax.xlane.f32.xlu1 %v939_v31 }
 0x4a2   : > { %937 = vmax.xlane.f32.xlu0 %v936_v33 }
 0x4a6   : > { %946 = vmax.xlane.f32.xlu0 %v945_v34 }
 0x4aa   : > { %955 = vmax.xlane.f32.xlu0 %v954_v35 }
 0x4ae   : > { %949 = vmax.xlane.f32.xlu0 %v948_v22 }
 0x4c4   : > { %1036 = vrot.lane.b32.xlu0 %v3021_v27, %s2735_s30 }
 0x4ea   : > { %v1228_v37 = vpop.xlane.xlu0 %1227 }
 0x4eb   : > { %v1250_v39 = vsub.f32 %v1195_v1, %v1228_v37 }
 0x4ec   : > { %v1231_v40 = vpop.xlane.xlu1 %1230 }
 0x4ed   : > { %v1258_v41 = vmul.f32 1.442695, %v1250_v39  ;;  %v1251_v42 = vsub.f32 %v1198_v30, %v1231_v40  ;;  %v957_v40 = vsel %vm653_vm1, %v3141_v15, -inf }
 0x4ee   : > { %v1234_v43 = vpop.xlane.xlu0 %1233 }
 0x4ef   : > { %2574 = vpow2.f32 %v1258_v41  ;;  %v1260_v25 = vmul.f32 1.442695, %v1251_v42  ;;  %v1252_v36 = vsub.f32 %v2303_v0, %v1234_v43 }
 0x4f0   : > { %v1237_v38 = vpop.xlane.xlu1 %1236 }
 0x4f1   : > { %2576 = vpow2.f32 %v1260_v25  ;;  %v1262_v49 = vmul.f32 1.442695, %v1252_v36  ;;  %v1253_v47 = vsub.f32 %v2304_v4, %v1237_v38  ;;  %v951_v25 = vsel %vm653_vm1, %v3144_v5, -inf }
 0x4f2   : > { %v3181_v46 = vpop.xlane.xlu0 %1239 }
 0x4f3   : > { %2578 = vpow2.f32 %v1262_v49  ;;  %v1264_v28 = vmul.f32 1.442695, %v1253_v47  ;;  %v1254_v48 = vsub.f32 %v3149_v17, %v3181_v46 }
 0x4f4   : > { %v3185_v6 = vpop.xlane.xlu1 %1242 }
 0x4f5   : > { %v1255_v1 = vsub.f32 %v3155_v20, %v3185_v6  ;;  %2580 = vpow2.f32 %v1264_v28 }
 0x4f6   : > { %v3189_v30 = vpop.xlane.xlu0 %1245 }
 0x4f7   : > { %v1256_v0 = vsub.f32 %v3146_v9, %v3189_v30 }
 0x4f8   : > { %v3193_v11 = vpop.xlane.xlu1 %1248 }
 0x4f9   : > { %v3195_v4 = vpop.eup %2574  ;;  %v1257_v8 = vsub.f32 %v3151_v18, %v3193_v11 }
 0x4fa   : > { %v1033_v16 = vpop.permute.xlu0 %1032  ;;  %v1274_v19 = vsel %vm653_vm1, %v3195_v4, 0.0 }
 0x4fb   : > { %v3201_v21 = vpop.eup %2576  ;;  %2277 = vmatprep.subr.bf16.mxu1 %v1033_v16  ;;  %1275 = vadd.xlane.f32.xlu1 %v1274_v19  ;;  %v1272_v17 = vmul.f32 1.442695, %v1257_v8 }
 0x4fc   : > { %2278 = vmatpush3.bf16.msra.mxu1 %v1033_v16  ;;  %v1035_v23 = vpop.permute.xlu1 %1034  ;;  %v1277_v24 = vsel %vm653_vm1, %v3201_v21, 0.0 }
 0x4fd   : > { %v3205_v29 = vpop.eup %2578  ;;  %1278 = vadd.xlane.f32.xlu0 %v1277_v24  ;;  %2279 = vmatprep.subr.bf16.mxu1 %v1035_v23 }
 0x4fe   : > { %v1280_v31 = vsel %vm653_vm1, %v3205_v29, 0.0 }
 0x4ff   : > { %v3209_v33 = vpop.eup %2580 }
 0x500   : > { %2280 = vmatpush3.bf16.msra.mxu1 %v1035_v23  ;;  %v1283_v34 = vsel %vm653_vm1, %v3209_v33, 0.0 }
 0x501   : > { %1281 = vadd.xlane.f32.xlu0 %v1280_v31 }
 0x505   : > { %1284 = vadd.xlane.f32.xlu0 %v1283_v34 }
 0x50c   : > { %1038 = vrot.lane.b32.xlu1 %v3018_v26, %s2735_s30 }
 0x52b   : > { %v944_v35 = vpop.xlane.xlu0 %943 }
 0x52c   : > { %v962_v22 = vsub.f32 %v3127_v60, %v944_v35 }
 0x52d   : > { %v941_v19 = vpop.xlane.xlu1 %940 }
 0x52e   : > { %v972_v37 = vmul.f32 1.442695, %v962_v22  ;;  %v961_v23 = vsub.f32 %v3133_v63, %v941_v19  ;;  %v1270_v63 = vmul.f32 1.442695, %v1256_v0 }
 0x52f   : > { %v938_v39 = vpop.xlane.xlu0 %937 }
 0x530   : > { %2582 = vpow2.f32 %v972_v37  ;;  %v960_v41 = vsub.f32 %v3129_v61, %v938_v39  ;;  %958 = vmax.xlane.f32.xlu1 %v957_v40  ;;  %v970_v34 = vmul.f32 1.442695, %v961_v23  ;;  %v1266_v39 = vmul.f32 1.442695, %v1254_v48 }
 0x532   : > { %v968_v42 = vmul.f32 1.442695, %v960_v41 }
 0x533   : > { %v947_v43 = vpop.xlane.xlu0 %946 }
 0x534   : > { %2584 = vpow2.f32 %v968_v42  ;;  %952 = vmax.xlane.f32.xlu1 %v951_v25  ;;  %v963_v16 = vsub.f32 %v3131_v62, %v947_v43 }
 0x536   : > { %v974_v24 = vmul.f32 1.442695, %v963_v16 }
 0x537   : > { %v956_v36 = vpop.xlane.xlu0 %955 }
 0x538   : > { %v966_v31 = vsub.f32 %v3136_v10, %v956_v36  ;;  %2586 = vpow2.f32 %v974_v24 }
 0x539   : > { %2588 = vpow2.f32 %v970_v34 }
 0x53a   : > { %v3221_v38 = vpop.eup %2582  ;;  %v980_v22 = vmul.f32 1.442695, %v966_v31 }
 0x53b   : > { %v950_v60 = vpop.xlane.xlu0 %949  ;;  %v990_v49 = vsel %vm653_vm1, %v3221_v38, 0.0 }
 0x53c   : > { %991 = vadd.xlane.f32.xlu0 %v990_v49  ;;  %v964_v35 = vsub.f32 %v3139_v12, %v950_v60  ;;  %2590 = vpow2.f32 %v980_v22 }
 0x53e   : > { %v3225_v47 = vpop.eup %2584  ;;  %v976_v37 = vmul.f32 1.442695, %v964_v35 }
 0x53f   : > { %v1037_v28 = vpop.permute.xlu0 %1036  ;;  %v984_v61 = vsel %vm653_vm1, %v3225_v47, 0.0 }
 0x540   : > { %985 = vadd.xlane.f32.xlu0 %v984_v61  ;;  %2281 = vmatprep.subr.bf16.mxu1 %v1037_v28  ;;  %2592 = vpow2.f32 %v976_v37 }
 0x541   : > { %2282 = vmatpush3.bf16.msra.mxu1 %v1037_v28  ;;  %2594 = vpow2.f32 %v1266_v39 }
 0x542   : > { %v3242_v62 = vpop.eup %2586  ;;  %2596 = vpow2.f32 %v1270_v63 }
 0x543   : > { %v993_v10 = vsel %vm653_vm1, %v3242_v62, 0.0  ;;  %v3249_v12 = vpop.eup %2588  ;;  %2598 = vpow2.f32 %v1272_v17 }
 0x544   : > { %v987_v48 = vsel %vm653_vm1, %v3249_v12, 0.0 }
 0x545   : > { %1320 = vrot.lane.b32.xlu1 %v2999_v7, %s2736_s13 }
 0x546   : > { %v3254_v46 = vpop.eup %2590 }
 0x547   : > { %v1002_v30 = vsel %vm653_vm1, %v3254_v46, 0.0 }
 0x549   : > { %1322 = vrot.lane.b32.xlu1 %v3021_v27, %s2736_s13 }
 0x54a   : > { %v3258_v40 = vpop.eup %2592 }
 0x54b   : > { %v996_v9 = vsel %vm653_vm1, %v3258_v40, 0.0  ;;  %v3264_v0 = vpop.eup %2594 }
 0x54c   : > { %v1286_v18 = vsel %vm653_vm1, %v3264_v0, 0.0  ;;  %v3268_v11 = vpop.eup %2596 }
 0x54d   : > { %v1292_v8 = vsel %vm653_vm1, %v3268_v11, 0.0  ;;  %v3272_v41 = vpop.eup %2598 }
 0x54e   : > { %v1295_v42 = vsel %vm653_vm1, %v3272_v41, 0.0 }
 0x556   : > { %1318 = vrot.lane.b32.xlu0 %v3003_v32, %s2736_s13 }
 0x56d   : > { %994 = vadd.xlane.f32.xlu1 %v993_v10 }
 0x571   : > { %988 = vadd.xlane.f32.xlu1 %v987_v48  ;;  %v1268_v48 = vmul.f32 1.442695, %v1255_v1 }
 0x575   : > { %997 = vadd.xlane.f32.xlu0 %v996_v9  ;;  %1003 = vadd.xlane.f32.xlu1 %v1002_v30 }
 0x579   : > { %1287 = vadd.xlane.f32.xlu0 %v1286_v18 }
 0x57d   : > { %1293 = vadd.xlane.f32.xlu0 %v1292_v8 }
 0x581   : > { %1296 = vadd.xlane.f32.xlu0 %v1295_v42 }
 0x588   : > { %v1276_v43 = vpop.xlane.xlu1 %1275 }
 0x589   : > { %2600 = vrcp.f32 %v1276_v43 }
 0x58a   : > { %v1279_v25 = vpop.xlane.xlu0 %1278 }
 0x58b   : > { %2602 = vrcp.f32 %v1279_v25 }
 0x58c   : > { %v1039_v36 = vpop.permute.xlu1 %1038 }
 0x58d   : > { %2283 = vmatprep.subr.bf16.mxu1 %v1039_v36 }
 0x58e   : > { %v1282_v60 = vpop.xlane.xlu0 %1281  ;;  %2284 = vmatpush3.bf16.msra.mxu1 %v1039_v36 }
 0x58f   : > { %2604 = vrcp.f32 %v1282_v60 }
 0x592   : > { %v1285_v49 = vpop.xlane.xlu0 %1284 }
 0x593   : > { %v2601_v28 = vpop.eup %2600  ;;  %2606 = vrcp.f32 %v1285_v49 }
 0x594   : > { %v3277_v16 = vmul.f32 %v2601_v28, %v3195_v4 }
 0x595   : > { %v2603_v61 = vpop.eup %2602 }
 0x596   : > { %v3280_v19 = vmul.f32 %v2603_v61, %v3201_v21 }
 0x597   : > { %1415 = vrot.lane.b32.xlu0 %v2904_v45, %s2737_s14 }
 0x598   : > { %v1314_v23 = vpack.c.bf16 %v3280_v19, %v3277_v16 }
 0x599   : > { %v2605_v24 = vpop.eup %2604 }
 0x59a   : > { %v3289_v34 = vmul.f32 %v2605_v24, %v3205_v29 }
 0x59b   : > { %1407 = vrot.lane.b32.xlu0 %v2902_v44, %s2737_s14 }
 0x59d   : > { %v2607_v31 = vpop.eup %2606 }
 0x59e   : > { %v3292_v4 = vmul.f32 %v2607_v31, %v3209_v33 }
 0x59f   : > { %1411 = vrot.lane.b32.xlu0 %v2920_v2, %s2737_s14 }
 0x5a0   : > { %v1315_v45 = vpack.c.bf16 %v3292_v4, %v3289_v34 }
 0x5bd   : > { %v959_v21 = vpop.xlane.xlu1 %958 }
 0x5be   : > { %v967_v35 = vsub.f32 %v3141_v15, %v959_v21 }
 0x5c0   : > { %v982_v22 = vmul.f32 1.442695, %v967_v35 }
 0x5c1   : > { %v953_v37 = vpop.xlane.xlu1 %952 }
 0x5c2   : > { %2608 = vpow2.f32 %v982_v22  ;;  %v965_v44 = vsub.f32 %v3144_v5, %v953_v37 }
 0x5c4   : > { %v978_v39 = vmul.f32 1.442695, %v965_v44 }
 0x5c5   : > { %v1321_v5 = vpop.permute.xlu1 %1320 }
 0x5c6   : > { %2610 = vpow2.f32 %v978_v39 }
 0x5c7   : > { %2612 = vpow2.f32 %v1268_v48 }
 0x5c9   : > { %v992_v29 = vpop.xlane.xlu0 %991  ;;  %v1323_v9 = vpop.permute.xlu1 %1322 }
 0x5cc   : > { %v3300_v63 = vpop.eup %2608 }
 0x5cd   : > { %v986_v33 = vpop.xlane.xlu0 %985  ;;  %v1005_v2 = vsel %vm653_vm1, %v3300_v63, 0.0 }
 0x5ce   : > { %1006 = vadd.xlane.f32.xlu1 %v1005_v2 }
 0x5d0   : > { %v3304_v10 = vpop.eup %2610 }
 0x5d1   : > { %v1319_v17 = vpop.permute.xlu0 %1318  ;;  %v999_v15 = vsel %vm653_vm1, %v3304_v10, 0.0  ;;  %v3313_v8 = vpop.eup %2612 }
 0x5d2   : > { %2309 = vmatprep.subr.bf16.mxu1 %v1319_v17  ;;  %1000 = vadd.xlane.f32.xlu1 %v999_v15  ;;  %v1289_v43 = vsel %vm653_vm1, %v3313_v8, 0.0 }
 0x5e3   : > { %1324 = vrot.lane.b32.xlu1 %v3018_v26, %s2736_s13 }
 0x5fa   : > { %v995_v30 = vpop.xlane.xlu1 %994 }
 0x5fb   : > { %2614 = vrcp.f32 %v995_v30 }
 0x5fc   : > { %2616 = vrcp.f32 %v986_v33 }
 0x5fd   : > { %2618 = vrcp.f32 %v992_v29 }
 0x5fe   : > { %v989_v18 = vpop.xlane.xlu1 %988 }
 0x5ff   : > { %2620 = vrcp.f32 %v989_v18 }
 0x605   : > { %v2615_v42 = vpop.eup %2614 }
 0x606   : > { %v2617_v25 = vpop.eup %2616  ;;  %v1019_v20 = vmul.f32 %v2615_v42, %v3242_v62  ;;  %v1004_v62 = vpop.xlane.xlu1 %1003 }
 0x607   : > { %1290 = vadd.xlane.f32.xlu1 %v1289_v43  ;;  %v2619_v36 = vpop.eup %2618  ;;  %v1016_v6 = vmul.f32 %v2617_v25, %v3225_v47 }
 0x608   : > { %v1018_v49 = vmul.f32 %v2619_v36, %v3221_v38  ;;  %v998_v38 = vpop.xlane.xlu0 %997 }
 0x609   : > { %v2621_v60 = vpop.eup %2620 }
 0x60a   : > { %v1017_v1 = vmul.f32 %v2621_v60, %v3249_v12  ;;  %v1025_v61 = vpack.c.bf16 %v1019_v20, %v1018_v49 }
 0x60c   : > { %v1024_v28 = vpack.c.bf16 %v1017_v1, %v1016_v6  ;;  %v1288_v47 = vpop.xlane.xlu0 %1287 }
 0x60e   : > { %2285 = vmatprep.mubr.msk.bf16.mxu1 %vm653_vm1, %v1024_v28 }
 0x60f   : > { %2286 = vmatmul.mubr.msk.bf16.vlgmr.msra.gmra.mrb[24].mxu1 %vm653_vm1, %v1025_v61 }
 0x610   : > { %2310 = vmatpush3.bf16.msra.mxu1 %v1319_v17  ;;  %v1294_v12 = vpop.xlane.xlu0 %1293 }
 0x611   : > { %2311 = vmatprep.subr.bf16.mxu1 %v1321_v5 }
 0x614   : > { %2312 = vmatpush3.bf16.msra.mxu1 %v1321_v5 }
 0x615   : > { %2313 = vmatprep.subr.bf16.mxu1 %v1323_v9 }
 0x618   : > { %2314 = vmatpush3.bf16.msra.mxu1 %v1323_v9  ;;  %1417 = vrot.lane.b32.xlu1 %v2914_v56, %s2737_s14  ;;  %v1297_v56 = vpop.xlane.xlu0 %1296 }
 0x61c   : > { %1419 = vrot.lane.b32.xlu1 %v2922_v3, %s2737_s14 }
 0x620   : > { %1421 = vrot.lane.b32.xlu1 %v2930_v14, %s2737_s14  ;;  %v1416_v14 = vpop.permute.xlu0 %1415 }
 0x621   : > { %v1436_v2 = vsel %vm563_vm0, %v1416_v14, 0 }
 0x624   : > { %1409 = vrot.lane.b32.xlu1 %v2912_v55, %s2737_s14  ;;  %v1408_v18 = vpop.permute.xlu0 %1407 }
 0x628   : > { %1413 = vrot.lane.b32.xlu1 %v2928_v13, %s2737_s14 }
 0x65b   : > { %v1007_v24 = vpop.xlane.xlu1 %1006 }
 0x65c   : > { %2622 = vrcp.f32 %v1007_v24 }
 0x65d   : > { %2624 = vrcp.f32 %v998_v38 }
 0x65e   : > { %2626 = vrcp.f32 %v1004_v62 }
 0x65f   : > { %v1001_v31 = vpop.xlane.xlu1 %1000 }
 0x660   : > { %2628 = vrcp.f32 %v1001_v31 }
 0x661   : > { %2630 = vrcp.f32 %v1297_v56 }
 0x662   : > { %2632 = vrcp.f32 %v1288_v47 }
 0x663   : > { %v1325_v3 = vpop.permute.xlu1 %1324  ;;  %2634 = vrcp.f32 %v1294_v12 }
 0x664   : > { %2315 = vmatprep.subr.bf16.mxu1 %v1325_v3 }
 0x665   : > { %2316 = vmatpush3.bf16.msra.mxu1 %v1325_v3 }
 0x666   : > { %2393 = vmatprep.subr.msk.bf16.mxu1 %vm563_vm0, %v1416_v14  ;;  %v2623_v55 = vpop.eup %2622 }
 0x667   : > { %v2625_v21 = vpop.eup %2624  ;;  %v1023_v22 = vmul.f32 %v2623_v55, %v3300_v63 }
 0x668   : > { %v2627_v13 = vpop.eup %2626  ;;  %v1020_v37 = vmul.f32 %v2625_v21, %v3258_v40 }
 0x669   : > { %v1022_v39 = vmul.f32 %v2627_v13, %v3254_v46 }
 0x66a   : > { %v2629_v35 = vpop.eup %2628 }
 0x66b   : > { %v1021_v44 = vmul.f32 %v2629_v35, %v3304_v10  ;;  %v1027_v33 = vpack.c.bf16 %v1023_v22, %v1022_v39  ;;  %v2631_v16 = vpop.eup %2630 }
 0x66d   : > { %v1026_v29 = vpack.c.bf16 %v1021_v44, %v1020_v37 }
 0x66f   : > { %2289 = vmatprep.mubr.msk.bf16.mxu1 %vm653_vm1, %v1026_v29 }
 0x670   : > { %2290 = vmatmul.mubr.msk.bf16.gmra.mrb[28].mxu1 %vm653_vm1, %v1027_v33 }
 0x671   : > { %2317 = vmatprep.mubr.msk.bf16.mxu1 %vm653_vm1, %v1314_v23  ;;  %v2633_v23 = vpop.eup %2632 }
 0x672   : > { %v2635_v34 = vpop.eup %2634  ;;  %v1310_v10 = vmul.f32 %v2633_v23, %v3264_v0 }
 0x673   : > { %v1312_v5 = vmul.f32 %v2635_v34, %v3268_v11 }
 0x678   : > { %2318 = vmatmul.mubr.msk.bf16.vlgmr.msra.gmra.mrb[32].mxu1 %vm653_vm1, %v1315_v45  ;;  %v1313_v45 = vmul.f32 %v2631_v16, %v3272_v41 }
 0x679   : > { %2326 = vmatpush3.bf16.xpose.msra.mxu1 %v1436_v2 }
 0x67a   : > { %v1317_v30 = vpack.c.bf16 %v1313_v45, %v1312_v5 }
 0x694   : > { %v1291_v46 = vpop.xlane.xlu1 %1290 }
 0x695   : > { %2636 = vrcp.f32 %v1291_v46 }
 0x698   : > { %v1418_v40 = vpop.permute.xlu1 %1417 }
 0x699   : > { %v1439_v63 = vsel %vm563_vm0, %v1418_v40, 0  ;;  %2394 = vmatprep.subr.msk.bf16.mxu1 %vm563_vm0, %v1418_v40 }
 0x69a   : > { %2328 = vmatpush3.bf16.xpose.msra.mxu1 %v1439_v63 }
 0x69c   : > { %v1420_v19 = vpop.permute.xlu1 %1419 }
 0x69d   : > { %2395 = vmatprep.subr.msk.bf16.mxu1 %vm563_vm0, %v1420_v19  ;;  %v1442_v15 = vsel %vm563_vm0, %v1420_v19, 0 }
 0x69f   : > { %v2637_v4 = vpop.eup %2636 }
 0x6a0   : > { %v1311_v17 = vmul.f32 %v2637_v4, %v3313_v8  ;;  %v1422_v48 = vpop.permute.xlu1 %1421  ;;  %v1412_v8 = vpop.permute.xlu0 %1411 }
 0x6a1   : > { %v1445_v0 = vsel %vm563_vm0, %v1422_v48, 0 }
 0x6a2   : > { %2330 = vmatpush3.bf16.xpose.msra.mxu1 %v1442_v15  ;;  %v1316_v9 = vpack.c.bf16 %v1311_v17, %v1310_v10 }
 0x6a3   : > { %2396 = vmatprep.subr.msk.bf16.mxu1 %vm563_vm0, %v1422_v48 }
 0x6a4   : > { %2321 = vmatprep.mubr.msk.bf16.mxu1 %vm653_vm1, %v1316_v9  ;;  %v1410_v41 = vpop.permute.xlu1 %1409 }
 0x6a5   : > { %2322 = vmatmul.mubr.msk.bf16.gmra.mrb[36].mxu1 %vm653_vm1, %v1317_v30 }
 0x6a6   : > { %2333 = vmatprep.mubr.msk.bf16.mxu1 %vm563_vm0, %v1408_v18 }
 0x6a8   : > { %v1414_v11 = vpop.permute.xlu1 %1413 }
 0x6aa   : > { %2332 = vmatpush3.bf16.xpose.msra.mxu1 %v1445_v0 }
 0x6b1   : > { %2334 = vmatmul.mubr.msk.bf16.vlgmr.msra.gmra.mrb[40].mxu1 %vm563_vm0, %v1410_v41 }
 0x6b2   : > { %2337 = vmatprep.mubr.msk.bf16.mxu1 %vm563_vm0, %v1412_v8 }
 0x6b9   : > { %2338 = vmatmul.mubr.msk.bf16.gmra.mrb[44].mxu1 %vm563_vm0, %v1414_v11 }
 0x6e2   : > { %v3365_v42 = vpop.f32.mrb[24].mxu1 }
 0x6e3   : > { %v3367_v43 = vpop.f32.mrb[25].mxu1 }
 0x6e4   : > { %v3369_v25 = vpop.f32.mrb[26].mxu1 }
 0x6e5   : > { %v2447_v36 = vpack.i.bf16 %v3369_v25, %v3365_v42  ;;  %v3373_v60 = vpop.f32.mrb[27].mxu1 }
 0x6e6   : > { %v2442_v20 = vpack.i.bf16 %v3373_v60, %v3367_v43 }
 0x743   : > { %v3377_v6 = vpop.f32.mrb[28].mxu1 }
 0x744   : > { %v3379_v1 = vpop.f32.mrb[29].mxu1 }
 0x745   : > { %v3381_v49 = vpop.f32.mrb[30].mxu1 }
 0x746   : > { %v2467_v28 = vpack.i.bf16 %v3381_v49, %v3377_v6  ;;  %v3385_v61 = vpop.f32.mrb[31].mxu1 }
 0x747   : > { %v2462_v38 = vpack.i.bf16 %v3385_v61, %v3379_v1 }
 0x74b   : > { %v3389_v47 = vpop.f32.mrb[32].mxu1 }
 0x74c   : > { %v3391_v62 = vpop.f32.mrb[33].mxu1 }
 0x74d   : > { %v3393_v12 = vpop.f32.mrb[34].mxu1 }
 0x74e   : > { %v2457_v24 = vpack.i.bf16 %v3393_v12, %v3389_v47  ;;  %v3397_v56 = vpop.f32.mrb[35].mxu1 }
 0x74f   : > { %v2452_v31 = vpack.i.bf16 %v3397_v56, %v3391_v62 }
 0x778   : > { %v3401_v3 = vpop.f32.mrb[36].mxu1 }
 0x779   : > { %v3403_v14 = vpop.f32.mrb[37].mxu1 }
 0x77a   : > { %v3405_v55 = vpop.f32.mrb[38].mxu1 }
 0x77b   : > { %v2487_v21 = vpack.i.bf16 %v3405_v55, %v3401_v3  ;;  %v3409_v13 = vpop.f32.mrb[39].mxu1 }
 0x77c   : > { %v2482_v35 = vpack.i.bf16 %v3409_v13, %v3403_v14 }
 0x784   : > { %v2335_v22 = vpop.f32.mrb[40].mxu1 }
 0x785   : > { %v1481_v37 = vpop.f32.mrb[41].mxu1  ;;  %v1518_v2 = vsel %vm653_vm1, %v2335_v22, -inf }
 0x786   : > { %v2336_v44 = vpop.f32.mrb[42].mxu1  ;;  %v1512_v39 = vsel %vm653_vm1, %v1481_v37, -inf }
 0x787   : > { %1513 = vmax.xlane.f32.xlu0 %v1512_v39  ;;  %v1484_v29 = vpop.f32.mrb[43].mxu1  ;;  %v1521_v16 = vsel %vm653_vm1, %v2336_v44, -inf }
 0x788   : > { %v1515_v33 = vsel %vm653_vm1, %v1484_v29, -inf }
 0x789   : > { %1516 = vmax.xlane.f32.xlu1 %v1515_v33 }
 0x78b   : > { %1519 = vmax.xlane.f32.xlu0 %v1518_v2 }
 0x78c   : > { %v2339_v46 = vpop.f32.mrb[44].mxu1 }
 0x78d   : > { %v1497_v40 = vpop.f32.mrb[45].mxu1  ;;  %v1530_v45 = vsel %vm653_vm1, %v2339_v46, -inf }
 0x78e   : > { %v3416_v63 = vpop.f32.mrb[46].mxu1  ;;  %v1524_v34 = vsel %vm653_vm1, %v1497_v40, -inf }
 0x78f   : > { %1522 = vmax.xlane.f32.xlu0 %v1521_v16  ;;  %v1500_v19 = vpop.f32.mrb[47].mxu1  ;;  %v1533_v4 = vsel %vm653_vm1, %v3416_v63, -inf }
 0x790   : > { %v1527_v23 = vsel %vm653_vm1, %v1500_v19, -inf }
 0x791   : > { %1528 = vmax.xlane.f32.xlu1 %v1527_v23 }
 0x793   : > { %1525 = vmax.xlane.f32.xlu0 %v1524_v34 }
 0x795   : > { %1534 = vmax.xlane.f32.xlu1 %v1533_v4 }
 0x797   : > { %1531 = vmax.xlane.f32.xlu0 %v1530_v45 }
 0x814   : > { %v1514_v10 = vpop.xlane.xlu0 %1513 }
 0x815   : > { %v1536_v17 = vsub.f32 %v1481_v37, %v1514_v10 }
 0x816   : > { %v1517_v15 = vpop.xlane.xlu1 %1516 }
 0x817   : > { %v1544_v9 = vmul.f32 1.442695, %v1536_v17  ;;  %v1537_v30 = vsub.f32 %v1484_v29, %v1517_v15 }
 0x818   : > { %v1520_v5 = vpop.xlane.xlu0 %1519 }
 0x819   : > { %v1538_v48 = vsub.f32 %v2335_v22, %v1520_v5  ;;  %v1546_v8 = vmul.f32 1.442695, %v1537_v30 }
 0x81b   : > { %v1548_v18 = vmul.f32 1.442695, %v1538_v48 }
 0x81c   : > { %v1523_v0 = vpop.xlane.xlu0 %1522 }
 0x81d   : > { %2638 = vpow2.f32 %v1548_v18  ;;  %v1539_v41 = vsub.f32 %v2336_v44, %v1523_v0 }
 0x81e   : > { %2640 = vpow2.f32 %v1544_v9  ;;  %v1529_v48 = vpop.xlane.xlu1 %1528 }
 0x81f   : > { %v1550_v11 = vmul.f32 1.442695, %v1539_v41 }
 0x820   : > { %v1526_v39 = vpop.xlane.xlu0 %1525 }
 0x821   : > { %2642 = vpow2.f32 %v1550_v11  ;;  %v1540_v33 = vsub.f32 %v1497_v40, %v1526_v39 }
 0x822   : > { %2644 = vpow2.f32 %v1546_v8  ;;  %v1535_v9 = vpop.xlane.xlu1 %1534 }
 0x823   : > { %v1552_v37 = vmul.f32 1.442695, %v1540_v33  ;;  %v1543_v30 = vsub.f32 %v3416_v63, %v1535_v9 }
 0x824   : > { %v1532_v2 = vpop.xlane.xlu0 %1531 }
 0x825   : > { %v1542_v16 = vsub.f32 %v2339_v46, %v1532_v2  ;;  %v1558_v18 = vmul.f32 1.442695, %v1543_v30 }
 0x827   : > { %v3424_v23 = vpop.eup %2638  ;;  %v1556_v34 = vmul.f32 1.442695, %v1542_v16 }
 0x828   : > { %v1566_v22 = vsel %vm653_vm1, %v3424_v23, 0.0  ;;  %v2641_v29 = vpop.eup %2640 }
 0x829   : > { %2646 = vpow2.f32 %v1556_v34  ;;  %1567 = vadd.xlane.f32.xlu0 %v1566_v22  ;;  %v1560_v4 = vsel %vm653_vm1, %v2641_v29, 0.0 }
 0x82a   : > { %2648 = vpow2.f32 %v1552_v37 }
 0x82b   : > { %v3428_v44 = vpop.eup %2642  ;;  %2650 = vpow2.f32 %v1558_v18 }
 0x82c   : > { %v1569_v40 = vsel %vm653_vm1, %v3428_v44, 0.0  ;;  %v2645_v45 = vpop.eup %2644 }
 0x82d   : > { %1561 = vadd.xlane.f32.xlu0 %v1560_v4  ;;  %1570 = vadd.xlane.f32.xlu1 %v1569_v40  ;;  %v1563_v46 = vsel %vm653_vm1, %v2645_v45, 0.0  ;;  %v2535_v40 = vld [vmem:[%s3613_s3 + $0x8] sm:$0xff]  }
 0x831   : > { %1564 = vadd.xlane.f32.xlu1 %v1563_v46  ;;  %v2537_v46 = vld [vmem:[%s3613_s3 + $0x18] sm:$0xff]  }
 0x833   : > { %v3434_v10 = vpop.eup %2646 }
 0x834   : > { %v1578_v17 = vsel %vm653_vm1, %v3434_v10, 0.0  ;;  %v3438_v15 = vpop.eup %2648 }
 0x835   : > { %1579 = vadd.xlane.f32.xlu0 %v1578_v17  ;;  %v1572_v5 = vsel %vm653_vm1, %v3438_v15, 0.0  ;;  %v2539_v17 = vld [vmem:[%s3613_s3 + $0x28] sm:$0xff]  }
 0x839   : > { %1573 = vadd.xlane.f32.xlu0 %v1572_v5  ;;  %v2541_v5 = vld [vmem:[%s3613_s3 + $0x38] sm:$0xff]  }
 0x842   : > { %1606 = vrot.lane.b32.xlu1 %v2999_v7, %s2737_s14  ;;  %v1541_v7 = vsub.f32 %v1500_v19, %v1529_v48 }
 0x846   : > { %1608 = vrot.lane.b32.xlu1 %v3021_v27, %s2737_s14  ;;  %v2651_v27 = vpop.eup %2650 }
 0x847   : > { %v1581_v43 = vsel %vm653_vm1, %v2651_v27, 0.0 }
 0x84f   : > { %1604 = vrot.lane.b32.xlu0 %v3003_v32, %s2737_s14  ;;  %v1554_v32 = vmul.f32 1.442695, %v1541_v7 }
 0x851   : > { %2652 = vpow2.f32 %v1554_v32 }
 0x853   : > { %2443 = vrot.lane.b32.xlu0 %v2442_v20, %s2737_s14 }
 0x857   : > { %2453 = vrot.lane.b32.xlu0 %v2452_v31, %s2736_s13 }
 0x85b   : > { %2463 = vrot.lane.b32.xlu0 %v2462_v38, %s2737_s14  ;;  %v2653_v60 = vpop.eup %2652 }
 0x85c   : > { %v1575_v20 = vsel %vm653_vm1, %v2653_v60, 0.0 }
 0x86a   : > { %1582 = vadd.xlane.f32.xlu1 %v1581_v43 }
 0x86e   : > { %1576 = vadd.xlane.f32.xlu1 %v1575_v20 }
 0x87f   : > { %1610 = vrot.lane.b32.xlu1 %v3018_v26, %s2737_s14 }
 0x883   : > { %2448 = vrot.lane.b32.xlu1 %v2447_v36, %s2737_s14 }
 0x887   : > { %2458 = vrot.lane.b32.xlu1 %v2457_v24, %s2736_s13 }
 0x88b   : > { %2468 = vrot.lane.b32.xlu1 %v2467_v28, %s2737_s14  ;;  %s2676_s14 = scalar_lea.vmem %s2675_s12, 2048 }
 0x8b6   : > { %v1568_v1 = vpop.xlane.xlu0 %1567 }
 0x8ba   : > { %v1562_v61 = vpop.xlane.xlu0 %1561  ;;  %v1571_v38 = vpop.xlane.xlu1 %1570 }
 0x8bb   : > { %2654 = vrcp.f32 %v1562_v61 }
 0x8be   : > { %v1565_v26 = vpop.xlane.xlu1 %1564 }
 0x8bf   : > { %2656 = vrcp.f32 %v1565_v26 }
 0x8c0   : > { %2658 = vrcp.f32 %v1571_v38 }
 0x8c1   : > { %2660 = vrcp.f32 %v1568_v1 }
 0x8c2   : > { %v1580_v62 = vpop.xlane.xlu0 %1579  ;;  %v1607_v36 = vpop.permute.xlu1 %1606 }
 0x8c5   : > { %v2655_v42 = vpop.eup %2654 }
 0x8c6   : > { %v1574_v56 = vpop.xlane.xlu0 %1573  ;;  %v1592_v63 = vmul.f32 %v2655_v42, %v2641_v29  ;;  %v1609_v6 = vpop.permute.xlu1 %1608 }
 0x8c9   : > { %v2657_v25 = vpop.eup %2656 }
 0x8ca   : > { %v1605_v31 = vpop.permute.xlu0 %1604  ;;  %v1593_v47 = vmul.f32 %v2657_v25, %v2645_v45  ;;  %v2659_v28 = vpop.eup %2658  ;;  %v2536_v45 = vld [vmem:[%s3613_s3 + $0x10] sm:$0xff]  }
 0x8cb   : > { %2341 = vmatprep.subr.bf16.mxu0 %v1605_v31  ;;  %v2661_v19 = vpop.eup %2660  ;;  %v1595_v0 = vmul.f32 %v2659_v28, %v3428_v44 }
 0x8cc   : > { %2342 = vmatpush3.bf16.msra.mxu0 %v1605_v31  ;;  %v1600_v12 = vpack.c.bf16 %v1593_v47, %v1592_v63  ;;  %v1594_v8 = vmul.f32 %v2661_v19, %v3424_v23  ;;  %v2534_v23 = vld [vmem:[%s3613_s3] sm:$0xff]  }
 0x8cd   : > { %2343 = vmatprep.subr.bf16.mxu0 %v1607_v36 }
 0x8ce   : > { %2349 = vmatprep.mubr.msk.bf16.mxu0 %vm653_vm1, %v1600_v12  ;;  %v1601_v11 = vpack.c.bf16 %v1595_v0, %v1594_v8  ;;  %v2444_v26 = vpop.permute.xlu0 %2443 }
 0x8cf   : > { %v2445_v3 = vunpack.i.l.bf16 %v2444_v26  ;;  %v2446_v55 = vunpack.i.h.bf16 %v2444_v26 }
 0x8d0   : > { %2344 = vmatpush3.bf16.msra.mxu0 %v1607_v36 }
 0x8d1   : > { %2345 = vmatprep.subr.bf16.mxu0 %v1609_v6  ;;  %v1789_v31 = vsel %vm563_vm0, %v3113_v51, %v2445_v3  ;;  %v1790_v47 = vsel %vm563_vm0, %v3117_v53, %v2446_v55 }
 0x8d4   : > { %2346 = vmatpush3.bf16.msra.mxu0 %v1609_v6 }
 0x8f7   : > { %v1583_v49 = vpop.xlane.xlu1 %1582 }
 0x8f8   : > { %2662 = vrcp.f32 %v1583_v49 }
 0x8f9   : > { %2664 = vrcp.f32 %v1574_v56  ;;  %v2454_v56 = vpop.permute.xlu0 %2453 }
 0x8fa   : > { %2666 = vrcp.f32 %v1580_v62  ;;  %v2456_v63 = vunpack.i.h.bf16 %v2454_v56 }
 0x8fb   : > { %v1577_v24 = vpop.xlane.xlu1 %1576 }
 0x8fc   : > { %2668 = vrcp.f32 %v1577_v24  ;;  %v1798_v53 = vsel %vm653_vm1, %v1790_v47, %v2456_v63 }
 0x8fd   : > { %v2464_v25 = vpop.permute.xlu0 %2463 }
 0x8ff   : > { %v1611_v41 = vpop.permute.xlu1 %1610 }
 0x900   : > { %2347 = vmatprep.subr.bf16.mxu0 %v1611_v41 }
 0x901   : > { %2348 = vmatpush3.bf16.msra.mxu0 %v1611_v41 }
 0x902   : > { %v2663_v39 = vpop.eup %2662  ;;  %2357 = vmatprep.subr.bf16.mxu0 %v2534_v23 }
 0x903   : > { %v2665_v33 = vpop.eup %2664  ;;  %v1599_v37 = vmul.f32 %v2663_v39, %v2651_v27  ;;  %v2449_v38 = vpop.permute.xlu1 %2448  ;;  %v2466_v39 = vunpack.i.h.bf16 %v2464_v25 }
 0x904   : > { %2350 = vmatmul.mubr.msk.bf16.vlgmr.msra.gmra.mrb[32].mxu0 %vm653_vm1, %v1601_v11  ;;  %v2667_v2 = vpop.eup %2666  ;;  %v1596_v34 = vmul.f32 %v2665_v33, %v3438_v15  ;;  %v2540_v15 = vld [vmem:[%s3613_s3 + $0x30] sm:$0xff]   ;;  %v2451_v36 = vunpack.i.h.bf16 %v2449_v38  ;;  %v2450_v14 = vunpack.i.l.bf16 %v2449_v38  ;;  %v2101_v38 = vld [vmem:[%s3614_s4] ss:$0 sm:$0xff] }
 0x905   : > { %v1598_v29 = vmul.f32 %v2667_v2, %v3434_v10  ;;  %2358 = vmatpush3.bf16.msra.mxu0 %v2534_v23  ;;  %v2538_v10 = vld [vmem:[%s3613_s3 + $0x20] sm:$0xff]  }
 0x906   : > { %v2669_v16 = vpop.eup %2668  ;;  %2359 = vmatprep.subr.bf16.mxu0 %v2535_v40  ;;  %v1792_v49 = vsel %vm563_vm0, %v3115_v52, %v2451_v36  ;;  %v1791_v28 = vsel %vm563_vm0, %v3111_v50, %v2450_v14  ;;  %v2465_v52 = vunpack.i.l.bf16 %v2464_v25 }
 0x907   : > { %v1597_v22 = vmul.f32 %v2669_v16, %v2653_v60  ;;  %v1603_v44 = vpack.c.bf16 %v1599_v37, %v1598_v29  ;;  %v2459_v62 = vpop.permute.xlu1 %2458 }
 0x908   : > { %v2461_v13 = vunpack.i.h.bf16 %v2459_v62 }
 0x909   : > { %v1602_v4 = vpack.c.bf16 %v1597_v22, %v1596_v34  ;;  %2360 = vmatpush3.bf16.msra.mxu0 %v2535_v40 }
 0x90a   : > { %2361 = vmatprep.subr.bf16.mxu0 %v2536_v45  ;;  %v1800_v51 = vsel %vm653_vm1, %v1792_v49, %v2461_v13 }
 0x90b   : > { %2353 = vmatprep.mubr.msk.bf16.mxu0 %vm653_vm1, %v1602_v4  ;;  %v2469_v42 = vpop.permute.xlu1 %2468 }
 0x90c   : > { %2354 = vmatmul.mubr.msk.bf16.gmra.mrb[36].mxu0 %vm653_vm1, %v1603_v44  ;;  %v2471_v22 = vunpack.i.h.bf16 %v2469_v42  ;;  %v2470_v29 = vunpack.i.l.bf16 %v2469_v42 }
 0x90d   : > { %2362 = vmatpush3.bf16.msra.mxu0 %v2536_v45 }
 0x90e   : > { %2363 = vmatprep.subr.bf16.mxu0 %v2537_v46 }
 0x911   : > { %2364 = vmatpush3.bf16.msra.mxu0 %v2537_v46 }
 0x912   : > { %2365 = vmatprep.subr.bf16.mxu0 %v2538_v10 }
 0x915   : > { %2366 = vmatpush3.bf16.msra.mxu0 %v2538_v10  ;;  %v1794_v10 = vsel %vm563_vm0, %v3125_v59, %v2466_v39 }
 0x916   : > { %2367 = vmatprep.subr.bf16.mxu0 %v2539_v17 }
 0x919   : > { %2368 = vmatpush3.bf16.msra.mxu0 %v2539_v17  ;;  %v1793_v17 = vsel %vm563_vm0, %v3121_v57, %v2465_v52 }
 0x91a   : > { %2369 = vmatprep.subr.bf16.mxu0 %v2540_v15 }
 0x91d   : > { %2370 = vmatpush3.bf16.msra.mxu0 %v2540_v15 }
 0x91e   : > { %2371 = vmatprep.subr.bf16.mxu0 %v2541_v5 }
 0x921   : > { %2372 = vmatpush3.bf16.msra.mxu0 %v2541_v5  ;;  %v1796_v5 = vsel %vm563_vm0, %v3123_v58, %v2471_v22 }
 0x9d7   : > { %v2351_v48 = vpop.f32.mrb[32].mxu0 }
 0x9d8   : > { %v1662_v9 = vpop.f32.mrb[33].mxu0 }
 0x9d9   : > { %v2352_v30 = vpop.f32.mrb[34].mxu0 }
 0x9da   : > { %v2472_v7 = vpack.i.bf16 %v2352_v30, %v2351_v48  ;;  %v1665_v18 = vpop.f32.mrb[35].mxu0  ;;  %v1795_v48 = vsel %vm563_vm0, %v3119_v54, %v2470_v29 }
 0x9db   : > { %v2477_v32 = vpack.i.bf16 %v1665_v18, %v1662_v9 }
 0x9dc   : > { %2473 = vrot.lane.b32.xlu1 %v2472_v7, %s2735_s30 }
 0x9dd   : > { %2478 = vrot.lane.b32.xlu0 %v2477_v32, %s2735_s30 }
 0x9df   : > { %v2355_v27 = vpop.f32.mrb[36].mxu0 }
 0x9e0   : > { %2488 = vrot.lane.b32.xlu1 %v2487_v21, %s2736_s13  ;;  %v1678_v43 = vpop.f32.mrb[37].mxu0  ;;  %v2455_v21 = vunpack.i.l.bf16 %v2454_v56 }
 0x9e1   : > { %2483 = vrot.lane.b32.xlu0 %v2482_v35, %s2736_s13  ;;  %v2356_v60 = vpop.f32.mrb[38].mxu0  ;;  %v2460_v35 = vunpack.i.l.bf16 %v2459_v62 }
 0x9e2   : > { %v2497_v20 = vpack.i.bf16 %v2356_v60, %v2355_v27  ;;  %v1681_v1 = vpop.f32.mrb[39].mxu0  ;;  %v1797_v12 = vsel %vm653_vm1, %v1789_v31, %v2455_v21 }
 0x9e3   : > { %v2492_v61 = vpack.i.bf16 %v1681_v1, %v1678_v43  ;;  %v1799_v41 = vsel %vm653_vm1, %v1791_v28, %v2460_v35 }
 0x9e4   : > { %2498 = vrot.lane.b32.xlu1 %v2497_v20, %s2735_s30 }
 0x9e5   : > { %2493 = vrot.lane.b32.xlu0 %v2492_v61, %s2735_s30  ;;  %s215_s30 = sand.u32 1, %s2724_s19  }
 0x9e6   : > { %s2042_s13 = sshll.u32 %s215_s30, 6  ;;  %s3569_s22 = scalar_lea.sflag [#allocation3], %s215_s30 }
 0x9e7   : > { %s217_s25 = scalar_lea.vmem [#allocation2], %s2042_s13 }
 0x9e8   : > { %s1976_s6 = sshll.u32 %s217_s25, 4  ;;  %s3565_s6 = int_to_ptr.vmem [resolvable:$true] %s1976_s6 }
 0x9e9   : > { %s2670_s10 = scalar_lea.vmem %s3565_s6, 1024  ;;  %p2677_p0 = scmp.lt.s32.totalorder %s3565_s6, %s2675_s12 }
 0x9ea   : > { %p2671_p11 = scmp.ne.s32.totalorder %s3565_s6, %s2670_s10  ;;  %p2678_p1 = scmp.lt.s32.totalorder %s2676_s14, %s2670_s10 }
 0x9ec   : > { %p2672_p12 = pnand %p2671_p11, %p2809_p5  ;;  %p2679_p2 = por %p2678_p1, %p2677_p0 }
 0x9ee   : > { %p2673_p13 = pneg %p2672_p12 }
 0x9f0   : > { %p2680_p3 = pnand %p2679_p2, %p2673_p13 }
 0xa4e   : > { %v2474_v6 = vpop.permute.xlu1 %2473 }
 0xa4f   : > { %v2476_v24 = vunpack.i.h.bf16 %v2474_v6  ;;  %v2475_v19 = vunpack.i.l.bf16 %v2474_v6  ;;  %v2479_v0 = vpop.permute.xlu0 %2478 }
 0xa50   : > { %v2481_v8 = vunpack.i.h.bf16 %v2479_v0  ;;  %v2480_v11 = vunpack.i.l.bf16 %v2479_v0 }
 0xa51   : > { %v1808_v33 = vsel %vm1805_vm2, %v1799_v41, %v2475_v19  ;;  %v1809_v2 = vsel %vm1805_vm2, %v1800_v51, %v2476_v24 }
 0xa52   : > { %v1815_v16 = vpack.c.bf16 %v1809_v2, %v1808_v33  ;;  %v2489_v37 = vpop.permute.xlu1 %2488  ;;  %v1806_v50 = vsel %vm1805_vm2, %v1797_v12, %v2480_v11  ;;  %v1807_v34 = vsel %vm1805_vm2, %v1798_v53, %v2481_v8 }
 0xa53   : > { %v2484_v4 = vpop.permute.xlu0 %2483  ;;  %v1814_v44 = vpack.c.bf16 %v1807_v34, %v1806_v50  ;;  %v2491_v23 = vunpack.i.h.bf16 %v2489_v37  ;;  %v2490_v40 = vunpack.i.l.bf16 %v2489_v37 }
 0xa54   : > { %v2486_v45 = vunpack.i.h.bf16 %v2484_v4  ;;  %v2485_v46 = vunpack.i.l.bf16 %v2484_v4 }
 0xa55   : > { %2373 = vmatprep.mubr.bf16.mxu0 %v1814_v44  ;;  %v1803_v18 = vsel %vm653_vm1, %v1795_v48, %v2490_v40  ;;  %v1804_v59 = vsel %vm653_vm1, %v1796_v5, %v2491_v23 }
 0xa56   : > { %v2499_v15 = vpop.permute.xlu1 %2498  ;;  %2374 = vmatmul.mubr.bf16.vlgmr.msra.gmra.mrb[40].mxu0 %v1815_v16  ;;  %v1802_v57 = vsel %vm653_vm1, %v1794_v10, %v2486_v45  ;;  %v1801_v43 = vsel %vm653_vm1, %v1793_v17, %v2485_v46 }
 0xa57   : > { %v2501_v9 = vunpack.i.h.bf16 %v2499_v15  ;;  %v2500_v30 = vunpack.i.l.bf16 %v2499_v15  ;;  %v2494_v7 = vpop.permute.xlu0 %2493 }
 0xa58   : > { %v2496_v32 = vunpack.i.h.bf16 %v2494_v7  ;;  %v2495_v27 = vunpack.i.l.bf16 %v2494_v7 }
 0xa59   : > { %v1812_v58 = vsel %vm1805_vm2, %v1803_v18, %v2500_v30  ;;  %v1813_v60 = vsel %vm1805_vm2, %v1804_v59, %v2501_v9 }
 0xa5a   : > { %v1810_v54 = vsel %vm1805_vm2, %v1801_v43, %v2495_v27  ;;  %v1811_v20 = vsel %vm1805_vm2, %v1802_v57, %v2496_v32  ;;  %v1817_v1 = vpack.c.bf16 %v1813_v60, %v1812_v58 }
 0xa5b   : > { %v1816_v61 = vpack.c.bf16 %v1811_v20, %v1810_v54 }
 0xa5d   : > { %2377 = vmatprep.mubr.bf16.mxu0 %v1816_v61 }
 0xa5e   : > { %2378 = vmatmul.mubr.bf16.gmra.mrb[44].mxu0 %v1817_v1 }
 0xb29   : > { %v2375_v26 = vpop.f32.mrb[40].mxu0 }
 0xb2a   : > { %v1932_v62 = vadd.f32 %v2375_v26, %v2101_v38  ;;  %v1923_v56 = vpop.f32.mrb[41].mxu0 }
 0xb2b   : > { %v1924_v3 = vadd.f32 %v2101_v38, %v1923_v56  ;;  %v2376_v55 = vpop.f32.mrb[42].mxu0 }
 0xb2c   : > { %1956 = vst [vmem:[%s217_s25 + $0x10] sm:$0xff] %v1932_v62  ;;  %v1935_v21 = vadd.f32 %v2376_v55, %v2101_v38  ;;  %v1926_v42 = vpop.f32.mrb[43].mxu0 }
 0xb2d   : > { %1954 = vst [vmem:[%s217_s25] sm:$0xff] %v1924_v3  ;;  %v1927_v25 = vadd.f32 %v2101_v38, %v1926_v42 }
 0xb2e   : > { %1957 = vst [vmem:[%s217_s25 + $0x18] sm:$0xff] %v1935_v21 }
 0xb2f   : > { %1955 = vst [vmem:[%s217_s25 + $0x8] sm:$0xff] %v1927_v25 }
 0xb31   : > { %v2379_v36 = vpop.f32.mrb[44].mxu0 }
 0xb32   : > { %v1948_v14 = vadd.f32 %v2379_v36, %v2101_v38  ;;  %v1939_v13 = vpop.f32.mrb[45].mxu0 }
 0xb33   : > { %v1940_v35 = vadd.f32 %v2101_v38, %v1939_v13  ;;  %v2380_v31 = vpop.f32.mrb[46].mxu0 }
 0xb34   : > { %1960 = vst [vmem:[%s217_s25 + $0x30] sm:$0xff] %v1948_v14  ;;  %v1951_v63 = vadd.f32 %v2380_v31, %v2101_v38  ;;  %v1942_v47 = vpop.f32.mrb[47].mxu0 }
 0xb35   : > { %1958 = vst [vmem:[%s217_s25 + $0x20] sm:$0xff] %v1940_v35  ;;  %v1943_v12 = vadd.f32 %v2101_v38, %v1942_v47 }
 0xb36   : > { %1961 = vst [vmem:[%s217_s25 + $0x38] sm:$0xff] %v1951_v63 }
 0xb37   : > { %1959 = vst [vmem:[%s217_s25 + $0x28] sm:$0xff] %v1943_v12 }
 0xb38   : > { %2683 = shalt.err (!%p2680_p3)
}
 0xb39   : > { %s2684_s15 = scalar_lea.hbm %s3563_s9, 1024  ;;  %s2688_s13 = scalar_lea.hbm %s3615_s5, 2048 }
 0xb3a   : > { %p2685_p4 = scmp.ne.s32.totalorder %s3563_s9, %s2684_s15  ;;  %p2689_p9 = scmp.lt.u32.totalorder %s3563_s9, %s3615_s5 }
 0xb3b   : > { %p2690_p10 = scmp.lt.u32.totalorder %s2688_s13, %s2684_s15  ;;  %p2692_p12 = scmp.lt.u32.totalorder %s2684_s15, %s3563_s9 }
 0xb3c   : > { %p2686_p7 = pnand %p2685_p4, %p2809_p5 }
 0xb3d   : > { %p2691_p11 = por %p2690_p10, %p2689_p9 }
 0xb3e   : > { %p2687_p8 = pneg %p2686_p7 }
 0xb3f   : > { %p2693_p13 = por %p2692_p12, %p2691_p11 }
 0xb41   : > { %p2694_p0 = pnand %p2693_p13, %p2687_p8 }
 0xb43   : > { %2697 = shalt.err (!%p2694_p0)
}
 0xb44   : > { %s2739_s25 = smov 128   ;;  %s2740_s26 = smov 8  }
 0xb45   : > { %2397 = dma.vmem_to_hbm [thread:$0]  (%p2809_p5), %s3565_s6, 1024, %s3563_s9, %s3569_s22, %s2739_s25, %s2739_s25, %s2740_s26  }
 0xb46 PF: > { %p2403_p1 = scmp.ge.s32.totalorder %s2732_s21, 2  ;;  %s1991_s7 = sand.u32 1, %s2720_s18  }
 0xb47   : > { %s1992_s8 = scalar_lea.sflag [#allocation3], %s1991_s7 }
 0xb48   : > { %p2400_p2 = pnand %p2403_p1, %p2813_p6 }
 0xb4a   : > { %2715 = dma.done.wait (!%p2400_p2), %s1992_s8, 1024  }
 0xb4b   : > { %2717 = vsyncadd (!%p2400_p2), %s1992_s8, 4294966272  ;;  %p15_p3 = scmp.ge.s32.totalorder %s2796_s24, 4   ;;  %s3618_s18 = smov %s2724_s19 }
 0xb4c   : > { %s3619_s19 = smov %s2728_s20  ;;  %s3620_s20 = smov %s2807_s27 }
 0xb4d   : > { %s3621_s21 = smov %s2796_s24  ;;  %17 = sbr.rel (!%p15_p3) target bundleno = 3 (0x3), region = 75 }
 0xb54   :  { %1997 = vsyncpa [#allocation3], 1 }
 0xb55   :  { %1999 = vsyncpa [#allocation3 + $0x1], 1 }

</bundles_post_ra>
